<compile_context>
chip_gen: v6e
topology: v6e:2x2x1
jax: 0.10.0
libtpu: 0.0.40
codegen_flags: <defaults>
</compile_context>

<pallas_src>
import jax
import jax.numpy as jnp
import numpy as np
from jax.experimental import pallas as pl
from jax.experimental.pallas import tpu as pltpu


def _round_up(x, m):
    return (x + m - 1) // m * m


# ----------------------------------------------------------------------------
# Pallas kernel: post-embedding forward pass for ONE batch tile.
# ----------------------------------------------------------------------------
def basemodel_kernel(
    pooled_ref,                  # (TB, E)     bf16  mean-pooled word embeddings
    v_ref,                       # (TB, N, Dv) bf16  visual features
    vmask_ref,                   # (TB, N)     f32   object mask
    wqe_ref, bqe_ref,            # q encoder linear   (E, Dq) bf16 / (1, Dq) f32
    wav_ref, bav_ref,            # attention v-proj   (Dv, H) bf16 / (1, H)  f32
    waq_ref, baq_ref,            # attention q-proj   (Dq, H) bf16 / (1, H)  f32
    wal_ref,                     # attention logit w  (1, H)  bf16  (pre-transposed)
    bal_ref,                     # attention logit b  (1, 1)  f32 in SMEM
    wqn_ref, bqn_ref,            # q_net              (Dq, Hid) / (1, Hid)
    wvn_ref, bvn_ref,            # v_net              (Dv, Hid) / (1, Hid)
    wc1_ref, bc1_ref,            # classifier layer 1 (Hid, 2Hid) / (1, 2Hid)
    wc2_ref, bc2_ref,            # classifier layer 2 (2Hid, A_pad) / (1, A_pad)
    logits_ref,                  # out: (TB, A_pad) f32
    joint_ref,                   # out: (TB, Hid)   f32
):
    f32 = jnp.float32
    bf16 = jnp.bfloat16

    pooled = pooled_ref[...]                      # (TB, E)  bf16
    v = v_ref[...]                                # (TB, N, Dv) bf16
    mask = vmask_ref[...]                         # (TB, N)  f32
    TB, N, Dv = v.shape

    # --- q_emb: mean-pool (done outside) + tanh(Linear) -----------------------
    # TODO(synk): real q_emb module is a GRU; tanh(Linear(mean-pool)) stand-in.
    q_emb = jnp.tanh(
        jnp.dot(pooled, wqe_ref[...], preferred_element_type=f32) + bqe_ref[...]
    )                                             # (TB, Dq) f32

    # --- v_att: attention logits -----------------------------------------------
    proj_v = jnp.maximum(
        jnp.dot(v.reshape(TB * N, Dv), wav_ref[...], preferred_element_type=f32)
        + bav_ref[...],
        0.0,
    )                                             # (TB*N, H) f32
    proj_q = jnp.maximum(
        jnp.dot(q_emb.astype(bf16), waq_ref[...], preferred_element_type=f32)
        + baq_ref[...],
        0.0,
    )                                             # (TB, H) f32
    H = proj_q.shape[-1]
    proj_v = proj_v.reshape(TB, N, H)

    # Fold the (H,1) logit projection into proj_q and reduce along the lane axis
    # (XLU/VPU) instead of materializing (TB*N, H) and running a 1-column matmul.
    qw = proj_q * wal_ref[...]                                  # (TB, H) f32
    att = jnp.sum(proj_v * qw[:, None, :], axis=-1)             # (TB, N) f32
    att = att + bal_ref[0, 0]

    # --- mask_softmax over objects (torch semantics) ----------------------------
    # torch subtracts one global max; here it is the per-batch-tile max, which
    # only differs through the 1e-5 epsilon term (negligible).
    m = jnp.max(att, axis=(0, 1), keepdims=True)                # (1, 1)
    x2 = jnp.exp(att - m)
    x3 = x2 * mask
    x3_sum = jnp.sum(x3, axis=1, keepdims=True) + 1e-5          # (TB, 1)
    att_w = x3 / x3_sum                                         # (TB, N)

    # --- v_emb = (att * v).sum(1) ------------------------------------------------
    v_emb = jnp.sum(att_w[:, :, None] * v.astype(f32), axis=1)  # (TB, Dv) f32

    # --- q_net / v_net (FCNet: relu(Linear)) -------------------------------------
    q_repr = jnp.maximum(
        jnp.dot(q_emb.astype(bf16), wqn_ref[...], preferred_element_type=f32)
        + bqn_ref[...],
        0.0,
    )                                                           # (TB, Hid)
    v_repr = jnp.maximum(
        jnp.dot(v_emb.astype(bf16), wvn_ref[...], preferred_element_type=f32)
        + bvn_ref[...],
        0.0,
    )                                                           # (TB, Hid)
    joint = q_repr * v_repr
    joint_ref[...] = joint

    # --- classifier: relu(Linear) -> Linear --------------------------------------
    h = jnp.maximum(
        jnp.dot(joint.astype(bf16), wc1_ref[...], preferred_element_type=f32)
        + bc1_ref[...],
        0.0,
    )                                                           # (TB, 2Hid)
    logits_ref[...] = (
        jnp.dot(h.astype(bf16), wc2_ref[...], preferred_element_type=f32)
        + bc2_ref[...]
    )                                                           # (TB, A_pad)


# ----------------------------------------------------------------------------
# Wrapper
# ----------------------------------------------------------------------------
def _vmem_limit_bytes():
    try:
        cap = pltpu.get_tpu_info().vmem_capacity_bytes
        return int(min(cap * 3 // 4, 100 * 1024 * 1024))   # ~48MiB v7x, ~96MiB v5e/v6e
    except Exception:
        return 48 * 1024 * 1024                             # safe on all generations


def base_model_forward(params, v, q, labels, bias, v_mask,
                       return_feat=False, tb=None):
    """Mirrors BaseModel.forward.  Returns (logits, loss, w_emb[, joint_repr])."""
    del bias  # only consumed by debias_loss_fn, which requires labels

    f32, bf16 = jnp.float32, jnp.bfloat16

    # w_emb gather + seq mean-pool: JAX glue (keeps the (B,S,E) tensor out of VMEM).
    w_emb = jnp.take(params["emb_table"], q, axis=0)            # (B, S, E) f32
    pooled = jnp.mean(w_emb, axis=1)                            # (B, E)    f32

    B, N, Dv = v.shape
    E = pooled.shape[1]
    Hid = params["wqn"].shape[1]
    A = params["wc2"].shape[1]

    if v_mask is None:
        # torch branch uses a plain softmax over dim=1; all-ones mask differs
        # only by the 1e-5 epsilon in the denominator.
        v_mask = jnp.ones((B, N), dtype=f32)

    # --- batch tiling / lane padding ------------------------------------------
    if tb is None:
        tb = min(128, _round_up(B, 16))
    tb = max(16, _round_up(tb, 16))          # bf16-friendly sublane multiple
    B_pad = _round_up(B, tb)
    A_pad = _round_up(A, 128)                # lane-dense logits store

    def pad_batch(x):
        if B_pad == B:
            return x
        return jnp.pad(x, [(0, B_pad - B)] + [(0, 0)] * (x.ndim - 1))

    pooled_p = pad_batch(pooled).astype(bf16)
    v_p = pad_batch(v).astype(bf16)
    mask_p = pad_batch(v_mask.astype(f32))

    wc2, bc2 = params["wc2"], params["bc2"]
    if A_pad != A:
        wc2 = jnp.pad(wc2, ((0, 0), (0, A_pad - A)))
        bc2 = jnp.pad(bc2, ((0, 0), (0, A_pad - A)))

    wal_row = params["wal"].reshape(1, -1)                      # (1, H)

    # TODO(synk): for very large answer vocabularies on v7x (64 MiB VMEM) add a
    # grid axis over A_pad tiles of wc2; at these sizes the bf16 weights fit resident.
    kernel_inputs = (
        pooled_p,                                               # (B_pad, E)     bf16
        v_p,                                                    # (B_pad, N, Dv) bf16
        mask_p,                                                 # (B_pad, N)     f32
        params["wqe"].astype(bf16), params["bqe"].astype(f32),
        params["wav"].astype(bf16), params["bav"].astype(f32),
        params["waq"].astype(bf16), params["baq"].astype(f32),
        wal_row.astype(bf16),
        params["bal"].astype(f32),                              # (1,1) -> SMEM
        params["wqn"].astype(bf16), params["bqn"].astype(f32),
        params["wvn"].astype(bf16), params["bvn"].astype(f32),
        params["wc1"].astype(bf16), params["bc1"].astype(f32),
        wc2.astype(bf16), bc2.astype(f32),
    )

    def batch_spec(shape):
        nd = len(shape)
        return pl.BlockSpec(shape, lambda i: (i,) + (0,) * (nd - 1))

    def resident_spec(x):
        nd = x.ndim
        return pl.BlockSpec(x.shape, lambda i: (0,) * nd)       # constant block -> resident

    in_specs = [
        batch_spec((tb, E)),
        batch_spec((tb, N, Dv)),
        batch_spec((tb, N)),
    ]
    for x in kernel_inputs[3:]:
        in_specs.append(resident_spec(x))
    # bal is a true scalar: keep it in SMEM, not a masked sub-(8,128) VMEM tile.
    in_specs[10] = pl.BlockSpec(memory_space=pltpu.MemorySpace.SMEM)

    grid = (B_pad // tb,)
    out_shapes = (
        jax.ShapeDtypeStruct((B_pad, A_pad), f32),
        jax.ShapeDtypeStruct((B_pad, Hid), f32),
    )
    out_specs = (
        pl.BlockSpec((tb, A_pad), lambda i: (i, 0)),
        pl.BlockSpec((tb, Hid), lambda i: (i, 0)),
    )

    logits_pad, joint_pad = pl.pallas_call(
        basemodel_kernel,
        grid=grid,
        out_shape=out_shapes,
        in_specs=in_specs,
        out_specs=out_specs,
        compiler_params=pltpu.CompilerParams(
            dimension_semantics=("parallel",),        # batch tiles shard across TCs on v7x
            vmem_limit_bytes=_vmem_limit_bytes(),
        ),
    )(*kernel_inputs)

    logits = logits_pad[:B, :A]
    joint_repr = joint_pad[:B]

    loss = None
    if labels is not None:
        # TODO(synk): debias_loss_fn is injected externally and undefined here.
        loss = None

    if return_feat:
        return logits, loss, w_emb, joint_repr
    return logits, loss, w_emb


# ----------------------------------------------------------------------------
# Pure-JAX reference (torch math, mirroring the kernel's bf16 quantization)
# ----------------------------------------------------------------------------
def reference_forward(params, v, q, v_mask):
    f32, bf16 = jnp.float32, jnp.bfloat16

    def bdot(x, w):
        return jnp.dot(x.astype(bf16), w.astype(bf16), preferred_element_type=f32)

    w_emb = jnp.take(params["emb_table"], q, axis=0)
    pooled = jnp.mean(w_emb, axis=1)
    q_emb = jnp.tanh(bdot(pooled, params["wqe"]) + params["bqe"])
    proj_v = jax.nn.relu(bdot(v, params["wav"]) + params["bav"])         # (B,N,H)
    proj_q = jax.nn.relu(bdot(q_emb, params["waq"]) + params["baq"])     # (B,H)
    wal32 = params["wal"].astype(bf16).astype(f32).reshape(-1)           # (H,)
    att = jnp.sum(proj_v * proj_q[:, None, :] * wal32[None, None, :], axis=-1)
    att = att + params["bal"][0, 0]                                      # (B,N)
    m = jnp.max(att)                                                     # torch global max
    x2 = jnp.exp(att - m)
    x3 = x2 * v_mask
    x3_sum = jnp.sum(x3, axis=1, keepdims=True) + 1e-5
    att_w = x3 / x3_sum
    v_emb = jnp.sum(att_w[:, :, None] * v.astype(bf16).astype(f32), axis=1)
    q_repr = jax.nn.relu(bdot(q_emb, params["wqn"]) + params["bqn"])
    v_repr = jax.nn.relu(bdot(v_emb, params["wvn"]) + params["bvn"])
    joint = q_repr * v_repr
    h = jax.nn.relu(bdot(joint, params["wc1"]) + params["bc1"])
    return bdot(h, params["wc2"]) + params["bc2"], joint


# ----------------------------------------------------------------------------
# Deterministic parameter construction (torch-Linear-style init)
# ----------------------------------------------------------------------------
def make_params(key, vocab, emb_dim, q_dim, v_dim, att_hid, num_hid, num_ans):
    ks = jax.random.split(key, 17)

    def lin(kw, kb, fan_in, fan_out):
        s = 1.0 / np.sqrt(fan_in)
        w = jax.random.uniform(kw, (fan_in, fan_out), jnp.float32, -s, s)
        b = jax.random.uniform(kb, (1, fan_out), jnp.float32, -s, s)
        return w, b

    p = {}
    p["emb_table"] = jax.random.normal(ks[0], (vocab, emb_dim), jnp.float32) * 0.1
    p["wqe"], p["bqe"] = lin(ks[1], ks[2], emb_dim, q_dim)
    p["wav"], p["bav"] = lin(ks[3], ks[4], v_dim, att_hid)
    p["waq"], p["baq"] = lin(ks[5], ks[6], q_dim, att_hid)
    p["wal"], p["bal"] = lin(ks[7], ks[8], att_hid, 1)
    p["wqn"], p["bqn"] = lin(ks[9], ks[10], q_dim, num_hid)
    p["wvn"], p["bvn"] = lin(ks[11], ks[12], v_dim, num_hid)
    p["wc1"], p["bc1"] = lin(ks[13], ks[14], num_hid, 2 * num_hid)
    p["wc2"], p["bc2"] = lin(ks[15], ks[16], 2 * num_hid, num_ans)
    return p


# ----------------------------------------------------------------------------
if __name__ == "__main__":
    def check(cfg_key, B, num_objs, obj_dim, seq_len, vocab, emb_dim,
              q_dim, att_hid, num_hid, num_ans, tb):
        kp, kv, kq = jax.random.split(cfg_key, 3)
        params = make_params(kp, vocab, emb_dim, q_dim, obj_dim,
                             att_hid, num_hid, num_ans)
        v = jax.random.normal(kv, (B, num_objs, obj_dim), jnp.float32)
        q = jax.random.randint(kq, (B, seq_len), 0, vocab, jnp.int32)
        v_mask = jnp.ones((B, num_objs), jnp.float32)
        v_mask = v_mask.at[0, num_objs // 2:].set(0.0)

        logits, loss, w_emb, joint = base_model_forward(
            params, v, q, labels=None, bias=None, v_mask=v_mask,
            return_feat=True, tb=tb)
        logits = jax.block_until_ready(logits)

        ref_logits, ref_joint = reference_forward(params, v, q, v_mask)
        np.testing.assert_allclose(np.asarray(logits), np.asarray(ref_logits),
                                   rtol=2e-3, atol=2e-3)
        np.testing.assert_allclose(np.asarray(joint), np.asarray(ref_joint),
                                   rtol=2e-3, atol=2e-3)
        assert logits.shape == (B, num_ans)
        assert joint.shape == (B, num_hid)
        assert w_emb.shape == (B, seq_len, emb_dim)
        assert loss is None

    root = jax.random.PRNGKey(0)
    k1, k2 = jax.random.split(root)

    # small toy config (single batch tile)
    check(k1, B=2, num_objs=8, obj_dim=32, seq_len=8, vocab=50, emb_dim=32,
          q_dim=32, att_hid=32, num_hid=32, num_ans=16, tb=None)

    # multi-tile grid config with MXU-friendly 128-wide feature dims
    check(k2, B=24, num_objs=16, obj_dim=128, seq_len=8, vocab=100, emb_dim=128,
          q_dim=128, att_hid=128, num_hid=128, num_ans=200, tb=16)

    print("KERNEL_OK")
</pallas_src>

<mosaic_0001>
module attributes {stable_mosaic.version = 11 : i64} {
  func.func @basemodel_kernel(%arg0: i32, %arg1: memref<16x32xbf16, #tpu.memory_space<vmem>>, %arg2: memref<16x8x32xbf16, #tpu.memory_space<vmem>>, %arg3: memref<16x8xf32, #tpu.memory_space<vmem>>, %arg4: memref<32x32xbf16, #tpu.memory_space<vmem>>, %arg5: memref<1x32xf32, #tpu.memory_space<vmem>>, %arg6: memref<32x32xbf16, #tpu.memory_space<vmem>>, %arg7: memref<1x32xf32, #tpu.memory_space<vmem>>, %arg8: memref<32x32xbf16, #tpu.memory_space<vmem>>, %arg9: memref<1x32xf32, #tpu.memory_space<vmem>>, %arg10: memref<1x32xbf16, #tpu.memory_space<vmem>>, %arg11: memref<1x1xf32, #tpu.memory_space<smem>>, %arg12: memref<32x32xbf16, #tpu.memory_space<vmem>>, %arg13: memref<1x32xf32, #tpu.memory_space<vmem>>, %arg14: memref<32x32xbf16, #tpu.memory_space<vmem>>, %arg15: memref<1x32xf32, #tpu.memory_space<vmem>>, %arg16: memref<32x64xbf16, #tpu.memory_space<vmem>>, %arg17: memref<1x64xf32, #tpu.memory_space<vmem>>, %arg18: memref<64x128xbf16, #tpu.memory_space<vmem>>, %arg19: memref<1x128xf32, #tpu.memory_space<vmem>>, %arg20: memref<16x128xf32, #tpu.memory_space<vmem>>, %arg21: memref<16x32xf32, #tpu.memory_space<vmem>>) attributes {dimension_semantics = [#tpu.dimension_semantics<parallel>], iteration_bounds = array<i64: 1>, scalar_prefetch = 0 : i64, scratch_operands = 0 : i64, tpu.core_type = #tpu.core_type<tc>, window_params = [{transform_indices = @transform_0, window_bounds = array<i64: 16, 32>}, {transform_indices = @transform_1, window_bounds = array<i64: 16, 8, 32>}, {transform_indices = @transform_2, window_bounds = array<i64: 16, 8>}, {pipeline_mode = #tpu.pipeline_mode<synchronous>, transform_indices = @transform_3, window_bounds = array<i64: 32, 32>}, {pipeline_mode = #tpu.pipeline_mode<synchronous>, transform_indices = @transform_4, window_bounds = array<i64: 1, 32>}, {pipeline_mode = #tpu.pipeline_mode<synchronous>, transform_indices = @transform_5, window_bounds = array<i64: 32, 32>}, {pipeline_mode = #tpu.pipeline_mode<synchronous>, transform_indices = @transform_6, window_bounds = array<i64: 1, 32>}, {pipeline_mode = #tpu.pipeline_mode<synchronous>, transform_indices = @transform_7, window_bounds = array<i64: 32, 32>}, {pipeline_mode = #tpu.pipeline_mode<synchronous>, transform_indices = @transform_8, window_bounds = array<i64: 1, 32>}, {pipeline_mode = #tpu.pipeline_mode<synchronous>, transform_indices = @transform_9, window_bounds = array<i64: 1, 32>}, {transform_indices = @transform_10, window_bounds = array<i64: 1, 1>}, {pipeline_mode = #tpu.pipeline_mode<synchronous>, transform_indices = @transform_11, window_bounds = array<i64: 32, 32>}, {pipeline_mode = #tpu.pipeline_mode<synchronous>, transform_indices = @transform_12, window_bounds = array<i64: 1, 32>}, {pipeline_mode = #tpu.pipeline_mode<synchronous>, transform_indices = @transform_13, window_bounds = array<i64: 32, 32>}, {pipeline_mode = #tpu.pipeline_mode<synchronous>, transform_indices = @transform_14, window_bounds = array<i64: 1, 32>}, {pipeline_mode = #tpu.pipeline_mode<synchronous>, transform_indices = @transform_15, window_bounds = array<i64: 32, 64>}, {pipeline_mode = #tpu.pipeline_mode<synchronous>, transform_indices = @transform_16, window_bounds = array<i64: 1, 64>}, {pipeline_mode = #tpu.pipeline_mode<synchronous>, transform_indices = @transform_17, window_bounds = array<i64: 64, 128>}, {pipeline_mode = #tpu.pipeline_mode<synchronous>, transform_indices = @transform_18, window_bounds = array<i64: 1, 128>}, {transform_indices = @transform_19, window_bounds = array<i64: 16, 128>}, {transform_indices = @transform_20, window_bounds = array<i64: 16, 32>}]} {
    %c0 = arith.constant 0 : index
    %c0_0 = arith.constant 0 : index
    %0 = vector.load %arg1[%c0, %c0_0] : memref<16x32xbf16, #tpu.memory_space<vmem>>, vector<16x32xbf16>
    %c0_1 = arith.constant 0 : index
    %c0_2 = arith.constant 0 : index
    %c0_3 = arith.constant 0 : index
    %1 = vector.load %arg2[%c0_1, %c0_2, %c0_3] : memref<16x8x32xbf16, #tpu.memory_space<vmem>>, vector<16x8x32xbf16>
    %c0_4 = arith.constant 0 : index
    %c0_5 = arith.constant 0 : index
    %2 = vector.load %arg3[%c0_4, %c0_5] : memref<16x8xf32, #tpu.memory_space<vmem>>, vector<16x8xf32>
    %c0_6 = arith.constant 0 : index
    %c0_7 = arith.constant 0 : index
    %3 = vector.load %arg4[%c0_6, %c0_7] : memref<32x32xbf16, #tpu.memory_space<vmem>>, vector<32x32xbf16>
    %cst = arith.constant dense<0.000000e+00> : vector<16x32xf32>
    %4 = tpu.matmul %0, %3, %cst {dimension_numbers = #tpu.dot_dimension_numbers<[1], [0], [0], [1], [0, 0, 1, 1], [], []>} : vector<16x32xbf16>, vector<32x32xbf16>, vector<16x32xf32> -> vector<16x32xf32>
    %c0_8 = arith.constant 0 : index
    %c0_9 = arith.constant 0 : index
    %5 = vector.load %arg5[%c0_8, %c0_9] : memref<1x32xf32, #tpu.memory_space<vmem>>, vector<1x32xf32>
    %6 = vector.broadcast %5 : vector<1x32xf32> to vector<16x32xf32>
    %7 = arith.addf %4, %6 : vector<16x32xf32>
    %8 = math.tanh %7 : vector<16x32xf32>
    %9 = vector.shape_cast %1 : vector<16x8x32xbf16> to vector<128x32xbf16>
    %c0_10 = arith.constant 0 : index
    %c0_11 = arith.constant 0 : index
    %10 = vector.load %arg6[%c0_10, %c0_11] : memref<32x32xbf16, #tpu.memory_space<vmem>>, vector<32x32xbf16>
    %cst_12 = arith.constant dense<0.000000e+00> : vector<128x32xf32>
    %11 = tpu.matmul %9, %10, %cst_12 {dimension_numbers = #tpu.dot_dimension_numbers<[1], [0], [0], [1], [0, 0, 1, 1], [], []>} : vector<128x32xbf16>, vector<32x32xbf16>, vector<128x32xf32> -> vector<128x32xf32>
    %c0_13 = arith.constant 0 : index
    %c0_14 = arith.constant 0 : index
    %12 = vector.load %arg7[%c0_13, %c0_14] : memref<1x32xf32, #tpu.memory_space<vmem>>, vector<1x32xf32>
    %13 = vector.broadcast %12 : vector<1x32xf32> to vector<128x32xf32>
    %14 = arith.addf %11, %13 : vector<128x32xf32>
    %cst_15 = arith.constant 0.000000e+00 : f32
    %15 = vector.broadcast %cst_15 : f32 to vector<128x32xf32>
    %16 = arith.maximumf %14, %15 : vector<128x32xf32>
    %17 = arith.truncf %8 : vector<16x32xf32> to vector<16x32xbf16>
    %c0_16 = arith.constant 0 : index
    %c0_17 = arith.constant 0 : index
    %18 = vector.load %arg8[%c0_16, %c0_17] : memref<32x32xbf16, #tpu.memory_space<vmem>>, vector<32x32xbf16>
    %cst_18 = arith.constant dense<0.000000e+00> : vector<16x32xf32>
    %19 = tpu.matmul %17, %18, %cst_18 {dimension_numbers = #tpu.dot_dimension_numbers<[1], [0], [0], [1], [0, 0, 1, 1], [], []>} : vector<16x32xbf16>, vector<32x32xbf16>, vector<16x32xf32> -> vector<16x32xf32>
    %c0_19 = arith.constant 0 : index
    %c0_20 = arith.constant 0 : index
    %20 = vector.load %arg9[%c0_19, %c0_20] : memref<1x32xf32, #tpu.memory_space<vmem>>, vector<1x32xf32>
    %21 = vector.broadcast %20 : vector<1x32xf32> to vector<16x32xf32>
    %22 = arith.addf %19, %21 : vector<16x32xf32>
    %cst_21 = arith.constant 0.000000e+00 : f32
    %23 = vector.broadcast %cst_21 : f32 to vector<16x32xf32>
    %24 = arith.maximumf %22, %23 : vector<16x32xf32>
    %25 = vector.shape_cast %16 : vector<128x32xf32> to vector<16x8x32xf32>
    %c0_22 = arith.constant 0 : index
    %c0_23 = arith.constant 0 : index
    %26 = vector.load %arg10[%c0_22, %c0_23] : memref<1x32xbf16, #tpu.memory_space<vmem>>, vector<1x32xbf16>
    %27 = arith.extf %26 : vector<1x32xbf16> to vector<1x32xf32>
    %28 = vector.broadcast %27 : vector<1x32xf32> to vector<16x32xf32>
    %29 = arith.mulf %24, %28 : vector<16x32xf32>
    %30 = vector.shape_cast %29 : vector<16x32xf32> to vector<16x1x32xf32>
    %31 = vector.broadcast %30 : vector<16x1x32xf32> to vector<16x8x32xf32>
    %32 = arith.mulf %25, %31 : vector<16x8x32xf32>
    %cst_24 = arith.constant dense<0.000000e+00> : vector<16x8xf32>
    %33 = vector.multi_reduction <add>, %32, %cst_24 [2] : vector<16x8x32xf32> to vector<16x8xf32>
    %c0_25 = arith.constant 0 : index
    %c0_26 = arith.constant 0 : index
    %34 = memref.load %arg11[%c0_25, %c0_26] : memref<1x1xf32, #tpu.memory_space<smem>>
    %35 = vector.broadcast %34 : f32 to vector<16x8xf32>
    %36 = arith.addf %33, %35 : vector<16x8xf32>
    %37 = vector.shape_cast %36 : vector<16x8xf32> to vector<1x16x8xf32>
    %cst_27 = arith.constant dense<0xFF800000> : vector<1xf32>
    %38 = vector.multi_reduction <maximumf>, %37, %cst_27 [1, 2] : vector<1x16x8xf32> to vector<1xf32>
    %39 = vector.shape_cast %38 : vector<1xf32> to vector<1x1x1xf32>
    %40 = vector.extract %39[0, 0, 0] : f32 from vector<1x1x1xf32>
    %41 = vector.broadcast %40 : f32 to vector<1x1xf32>
    %42 = vector.broadcast %41 : vector<1x1xf32> to vector<16x8xf32>
    %43 = arith.subf %36, %42 : vector<16x8xf32>
    %44 = math.exp %43 : vector<16x8xf32>
    %45 = arith.mulf %44, %2 : vector<16x8xf32>
    %cst_28 = arith.constant dense<0.000000e+00> : vector<16xf32>
    %46 = vector.multi_reduction <add>, %45, %cst_28 [1] : vector<16x8xf32> to vector<16xf32>
    %47 = vector.shape_cast %46 : vector<16xf32> to vector<16x1xf32>
    %cst_29 = arith.constant 9.99999974E-6 : f32
    %48 = vector.broadcast %cst_29 : f32 to vector<16x1xf32>
    %49 = arith.addf %47, %48 : vector<16x1xf32>
    %50 = vector.broadcast %49 : vector<16x1xf32> to vector<16x8xf32>
    %51 = arith.divf %45, %50 : vector<16x8xf32>
    %52 = vector.shape_cast %51 : vector<16x8xf32> to vector<16x8x1xf32>
    %53 = arith.extf %1 : vector<16x8x32xbf16> to vector<16x8x32xf32>
    %54 = vector.broadcast %52 : vector<16x8x1xf32> to vector<16x8x32xf32>
    %55 = arith.mulf %54, %53 : vector<16x8x32xf32>
    %cst_30 = arith.constant dense<0.000000e+00> : vector<16x32xf32>
    %56 = vector.multi_reduction <add>, %55, %cst_30 [1] : vector<16x8x32xf32> to vector<16x32xf32>
    %57 = arith.truncf %8 : vector<16x32xf32> to vector<16x32xbf16>
    %c0_31 = arith.constant 0 : index
    %c0_32 = arith.constant 0 : index
    %58 = vector.load %arg12[%c0_31, %c0_32] : memref<32x32xbf16, #tpu.memory_space<vmem>>, vector<32x32xbf16>
    %cst_33 = arith.constant dense<0.000000e+00> : vector<16x32xf32>
    %59 = tpu.matmul %57, %58, %cst_33 {dimension_numbers = #tpu.dot_dimension_numbers<[1], [0], [0], [1], [0, 0, 1, 1], [], []>} : vector<16x32xbf16>, vector<32x32xbf16>, vector<16x32xf32> -> vector<16x32xf32>
    %c0_34 = arith.constant 0 : index
    %c0_35 = arith.constant 0 : index
    %60 = vector.load %arg13[%c0_34, %c0_35] : memref<1x32xf32, #tpu.memory_space<vmem>>, vector<1x32xf32>
    %61 = vector.broadcast %60 : vector<1x32xf32> to vector<16x32xf32>
    %62 = arith.addf %59, %61 : vector<16x32xf32>
    %cst_36 = arith.constant 0.000000e+00 : f32
    %63 = vector.broadcast %cst_36 : f32 to vector<16x32xf32>
    %64 = arith.maximumf %62, %63 : vector<16x32xf32>
    %65 = arith.truncf %56 : vector<16x32xf32> to vector<16x32xbf16>
    %c0_37 = arith.constant 0 : index
    %c0_38 = arith.constant 0 : index
    %66 = vector.load %arg14[%c0_37, %c0_38] : memref<32x32xbf16, #tpu.memory_space<vmem>>, vector<32x32xbf16>
    %cst_39 = arith.constant dense<0.000000e+00> : vector<16x32xf32>
    %67 = tpu.matmul %65, %66, %cst_39 {dimension_numbers = #tpu.dot_dimension_numbers<[1], [0], [0], [1], [0, 0, 1, 1], [], []>} : vector<16x32xbf16>, vector<32x32xbf16>, vector<16x32xf32> -> vector<16x32xf32>
    %c0_40 = arith.constant 0 : index
    %c0_41 = arith.constant 0 : index
    %68 = vector.load %arg15[%c0_40, %c0_41] : memref<1x32xf32, #tpu.memory_space<vmem>>, vector<1x32xf32>
    %69 = vector.broadcast %68 : vector<1x32xf32> to vector<16x32xf32>
    %70 = arith.addf %67, %69 : vector<16x32xf32>
    %cst_42 = arith.constant 0.000000e+00 : f32
    %71 = vector.broadcast %cst_42 : f32 to vector<16x32xf32>
    %72 = arith.maximumf %70, %71 : vector<16x32xf32>
    %73 = arith.mulf %64, %72 : vector<16x32xf32>
    %c0_43 = arith.constant 0 : index
    %c0_44 = arith.constant 0 : index
    %74 = vector.load %arg21[%c0_43, %c0_44] : memref<16x32xf32, #tpu.memory_space<vmem>>, vector<16x32xf32>
    tpu.vector_store %arg21[%c0_43, %c0_44], %73 {strides = array<i32>} : memref<16x32xf32, #tpu.memory_space<vmem>>, vector<16x32xf32>,
    %75 = arith.truncf %73 : vector<16x32xf32> to vector<16x32xbf16>
    %c0_45 = arith.constant 0 : index
    %c0_46 = arith.constant 0 : index
    %76 = vector.load %arg16[%c0_45, %c0_46] : memref<32x64xbf16, #tpu.memory_space<vmem>>, vector<32x64xbf16>
    %cst_47 = arith.constant dense<0.000000e+00> : vector<16x64xf32>
    %77 = tpu.matmul %75, %76, %cst_47 {dimension_numbers = #tpu.dot_dimension_numbers<[1], [0], [0], [1], [0, 0, 1, 1], [], []>} : vector<16x32xbf16>, vector<32x64xbf16>, vector<16x64xf32> -> vector<16x64xf32>
    %c0_48 = arith.constant 0 : index
    %c0_49 = arith.constant 0 : index
    %78 = vector.load %arg17[%c0_48, %c0_49] : memref<1x64xf32, #tpu.memory_space<vmem>>, vector<1x64xf32>
    %79 = vector.broadcast %78 : vector<1x64xf32> to vector<16x64xf32>
    %80 = arith.addf %77, %79 : vector<16x64xf32>
    %cst_50 = arith.constant 0.000000e+00 : f32
    %81 = vector.broadcast %cst_50 : f32 to vector<16x64xf32>
    %82 = arith.maximumf %80, %81 : vector<16x64xf32>
    %83 = arith.truncf %82 : vector<16x64xf32> to vector<16x64xbf16>
    %c0_51 = arith.constant 0 : index
    %c0_52 = arith.constant 0 : index
    %84 = vector.load %arg18[%c0_51, %c0_52] : memref<64x128xbf16, #tpu.memory_space<vmem>>, vector<64x128xbf16>
    %cst_53 = arith.constant dense<0.000000e+00> : vector<16x128xf32>
    %85 = tpu.matmul %83, %84, %cst_53 {dimension_numbers = #tpu.dot_dimension_numbers<[1], [0], [0], [1], [0, 0, 1, 1], [], []>} : vector<16x64xbf16>, vector<64x128xbf16>, vector<16x128xf32> -> vector<16x128xf32>
    %c0_54 = arith.constant 0 : index
    %c0_55 = arith.constant 0 : index
    %86 = vector.load %arg19[%c0_54, %c0_55] : memref<1x128xf32, #tpu.memory_space<vmem>>, vector<1x128xf32>
    %87 = vector.broadcast %86 : vector<1x128xf32> to vector<16x128xf32>
    %88 = arith.addf %85, %87 : vector<16x128xf32>
    %c0_56 = arith.constant 0 : index
    %c0_57 = arith.constant 0 : index
    %89 = vector.load %arg20[%c0_56, %c0_57] : memref<16x128xf32, #tpu.memory_space<vmem>>, vector<16x128xf32>
    tpu.vector_store %arg20[%c0_56, %c0_57], %88 {strides = array<i32>} : memref<16x128xf32, #tpu.memory_space<vmem>>, vector<16x128xf32>,
    return
  }
  func.func @transform_0(%arg0: i32) -> (i32, i32) {
    %c0_i32 = arith.constant 0 : i32
    %c0_i32_0 = arith.constant 0 : i32
    return %arg0, %c0_i32 : i32, i32
  }
  func.func @transform_1(%arg0: i32) -> (i32, i32, i32) {
    %c0_i32 = arith.constant 0 : i32
    %c0_i32_0 = arith.constant 0 : i32
    %c0_i32_1 = arith.constant 0 : i32
    return %arg0, %c0_i32, %c0_i32_0 : i32, i32, i32
  }
  func.func @transform_2(%arg0: i32) -> (i32, i32) {
    %c0_i32 = arith.constant 0 : i32
    %c0_i32_0 = arith.constant 0 : i32
    return %arg0, %c0_i32 : i32, i32
  }
  func.func @transform_3(%arg0: i32) -> (i32, i32) {
    %c0_i32 = arith.constant 0 : i32
    %c0_i32_0 = arith.constant 0 : i32
    %c0_i32_1 = arith.constant 0 : i32
    return %c0_i32, %c0_i32_0 : i32, i32
  }
  func.func @transform_4(%arg0: i32) -> (i32, i32) {
    %c0_i32 = arith.constant 0 : i32
    %c0_i32_0 = arith.constant 0 : i32
    %c0_i32_1 = arith.constant 0 : i32
    return %c0_i32, %c0_i32_0 : i32, i32
  }
  func.func @transform_5(%arg0: i32) -> (i32, i32) {
    %c0_i32 = arith.constant 0 : i32
    %c0_i32_0 = arith.constant 0 : i32
    %c0_i32_1 = arith.constant 0 : i32
    return %c0_i32, %c0_i32_0 : i32, i32
  }
  func.func @transform_6(%arg0: i32) -> (i32, i32) {
    %c0_i32 = arith.constant 0 : i32
    %c0_i32_0 = arith.constant 0 : i32
    %c0_i32_1 = arith.constant 0 : i32
    return %c0_i32, %c0_i32_0 : i32, i32
  }
  func.func @transform_7(%arg0: i32) -> (i32, i32) {
    %c0_i32 = arith.constant 0 : i32
    %c0_i32_0 = arith.constant 0 : i32
    %c0_i32_1 = arith.constant 0 : i32
    return %c0_i32, %c0_i32_0 : i32, i32
  }
  func.func @transform_8(%arg0: i32) -> (i32, i32) {
    %c0_i32 = arith.constant 0 : i32
    %c0_i32_0 = arith.constant 0 : i32
    %c0_i32_1 = arith.constant 0 : i32
    return %c0_i32, %c0_i32_0 : i32, i32
  }
  func.func @transform_9(%arg0: i32) -> (i32, i32) {
    %c0_i32 = arith.constant 0 : i32
    %c0_i32_0 = arith.constant 0 : i32
    %c0_i32_1 = arith.constant 0 : i32
    return %c0_i32, %c0_i32_0 : i32, i32
  }
  func.func @transform_10(%arg0: i32) -> (i32, i32) {
    %c0_i32 = arith.constant 0 : i32
    %c0_i32_0 = arith.constant 0 : i32
    %c0_i32_1 = arith.constant 0 : i32
    return %c0_i32, %c0_i32_0 : i32, i32
  }
  func.func @transform_11(%arg0: i32) -> (i32, i32) {
    %c0_i32 = arith.constant 0 : i32
    %c0_i32_0 = arith.constant 0 : i32
    %c0_i32_1 = arith.constant 0 : i32
    return %c0_i32, %c0_i32_0 : i32, i32
  }
  func.func @transform_12(%arg0: i32) -> (i32, i32) {
    %c0_i32 = arith.constant 0 : i32
    %c0_i32_0 = arith.constant 0 : i32
    %c0_i32_1 = arith.constant 0 : i32
    return %c0_i32, %c0_i32_0 : i32, i32
  }
  func.func @transform_13(%arg0: i32) -> (i32, i32) {
    %c0_i32 = arith.constant 0 : i32
    %c0_i32_0 = arith.constant 0 : i32
    %c0_i32_1 = arith.constant 0 : i32
    return %c0_i32, %c0_i32_0 : i32, i32
  }
  func.func @transform_14(%arg0: i32) -> (i32, i32) {
    %c0_i32 = arith.constant 0 : i32
    %c0_i32_0 = arith.constant 0 : i32
    %c0_i32_1 = arith.constant 0 : i32
    return %c0_i32, %c0_i32_0 : i32, i32
  }
  func.func @transform_15(%arg0: i32) -> (i32, i32) {
    %c0_i32 = arith.constant 0 : i32
    %c0_i32_0 = arith.constant 0 : i32
    %c0_i32_1 = arith.constant 0 : i32
    return %c0_i32, %c0_i32_0 : i32, i32
  }
  func.func @transform_16(%arg0: i32) -> (i32, i32) {
    %c0_i32 = arith.constant 0 : i32
    %c0_i32_0 = arith.constant 0 : i32
    %c0_i32_1 = arith.constant 0 : i32
    return %c0_i32, %c0_i32_0 : i32, i32
  }
  func.func @transform_17(%arg0: i32) -> (i32, i32) {
    %c0_i32 = arith.constant 0 : i32
    %c0_i32_0 = arith.constant 0 : i32
    %c0_i32_1 = arith.constant 0 : i32
    return %c0_i32, %c0_i32_0 : i32, i32
  }
  func.func @transform_18(%arg0: i32) -> (i32, i32) {
    %c0_i32 = arith.constant 0 : i32
    %c0_i32_0 = arith.constant 0 : i32
    %c0_i32_1 = arith.constant 0 : i32
    return %c0_i32, %c0_i32_0 : i32, i32
  }
  func.func @transform_19(%arg0: i32) -> (i32, i32) {
    %c0_i32 = arith.constant 0 : i32
    %c0_i32_0 = arith.constant 0 : i32
    return %arg0, %c0_i32 : i32, i32
  }
  func.func @transform_20(%arg0: i32) -> (i32, i32) {
    %c0_i32 = arith.constant 0 : i32
    %c0_i32_0 = arith.constant 0 : i32
    return %arg0, %c0_i32 : i32, i32
  }
}

</mosaic_0001>

<bundles_post_ra>
// kernel: tpu_custom_call.1
= control target key start
LH: loop header
LB: loop body
LE: loop exit
PB: predicated region body
PF: predicated region fallthrough
CT: control target
= control target key end

     0   :  { %s2954_s0 = inlined_call_operand.hbm [shape: bf16[16,32], index: 0, kind: input, shape index: {}]   ;;  %s2955_s1 = inlined_call_operand.hbm [shape: bf16[16,8,32], index: 1, kind: input, shape index: {}]   ;;  %s2956_s2 = inlined_call_operand.vmem [shape: f32[16,8], index: 2, kind: input, shape index: {}]   ;;  %s2957_s3 = inlined_call_operand.vmem [shape: bf16[32,32], index: 3, kind: input, shape index: {}]   ;;  %s2958_s4 = inlined_call_operand.vmem [shape: f32[1,32], index: 4, kind: input, shape index: {}]   ;;  %s2959_s5 = inlined_call_operand.hbm [shape: bf16[32,32], index: 5, kind: input, shape index: {}]   ;;  %s2960_s6 = inlined_call_operand.vmem [shape: f32[1,32], index: 6, kind: input, shape index: {}]   ;;  %s2961_s7 = inlined_call_operand.hbm [shape: bf16[32,32], index: 7, kind: input, shape index: {}]   ;;  %s2962_s8 = inlined_call_operand.vmem [shape: f32[1,32], index: 8, kind: input, shape index: {}]   ;;  %s2963_s9 = inlined_call_operand.vmem [shape: bf16[1,32], index: 9, kind: input, shape index: {}]   ;;  %s2964_s10 = inlined_call_operand.<no memory space> [shape: f32[1,1], index: 10, kind: input, shape index: {}]   ;;  %s2965_s11 = inlined_call_operand.hbm [shape: bf16[32,32], index: 11, kind: input, shape index: {}]   ;;  %s2966_s12 = inlined_call_operand.vmem [shape: f32[1,32], index: 12, kind: input, shape index: {}]   ;;  %s2967_s13 = inlined_call_operand.hbm [shape: bf16[32,32], index: 13, kind: input, shape index: {}]   ;;  %s2968_s14 = inlined_call_operand.vmem [shape: f32[1,32], index: 14, kind: input, shape index: {}]   ;;  %s2969_s15 = inlined_call_operand.hbm [shape: bf16[32,64], index: 15, kind: input, shape index: {}]   ;;  %s2970_s16 = inlined_call_operand.vmem [shape: f32[1,64], index: 16, kind: input, shape index: {}]   ;;  %s2971_s17 = inlined_call_operand.vmem [shape: bf16[64,128], index: 17, kind: input, shape index: {}]   ;;  %s2972_s18 = inlined_call_operand.vmem [shape: f32[1,128], index: 18, kind: input, shape index: {}]   ;;  %s2973_s19 = inlined_call_operand.hbm [shape: f32[16,128], index: 19, kind: output, shape index: {0}]   ;;  %s2974_s20 = inlined_call_operand.hbm [shape: f32[16,32], index: 20, kind: output, shape index: {1}]  }
   0x1   :  { %2977 = sst [smem:[#allocation24_spill]] %s2954_s0 }
   0x2   :  { %2978 = sst [smem:[#allocation25_spill]] %s2955_s1 }
   0x3   :  { %2979 = sst [smem:[#allocation26_spill]] %s2956_s2 }
   0x4   :  { %2980 = sst [smem:[#allocation27_spill]] %s2957_s3 }
   0x5   :  { %2981 = sst [smem:[#allocation28_spill]] %s2958_s4 }
   0x6   :  { %27 = vsyncpa [#allocation4], 0 }
   0x7   :  { %28 = vsyncpa [#allocation7], 0 }
   0x8   :  { %29 = vsyncpa [#allocation10], 0 }
   0x9   :  { %30 = vsyncpa [#allocation13], 0 }
   0xa   :  { %31 = vsyncpa [#allocation5], 0 }
   0xb   :  { %32 = vsyncpa [#allocation17], 0  ;;  %s2380_s1 = smov [#allocation6]   ;;  %s2381_s23 = smov [#allocation9]  }
   0xc   :  { %s50_s22 = sshll.u32 %s2380_s1, 4  ;;  %s82_s24 = sshll.u32 %s2381_s23, 4  ;;  %s51_s22 = int_to_ptr.vmem [resolvable:$true] %s50_s22  ;;  %s83_s24 = int_to_ptr.vmem [resolvable:$true] %s82_s24 }
   0xd   :  { %s2196_s2 = scalar_lea.vmem %s51_s22, 1024  ;;  %p2201_p1 = scmp.lt.s32.totalorder %s51_s22, %s51_s22 }
   0xe   :  { %p2197_p0 = scmp.ne.s32.totalorder %s51_s22, %s2196_s2  ;;  %p2202_p2 = scmp.lt.s32.totalorder %s2196_s2, %s2196_s2 }
  0x10   :  { %p2203_p3 = por %p2202_p2, %p2201_p1 }
  0x12   :  { %p2204_p4 = pnand %p2203_p3, %p2197_p0 }
  0x14   :  { %2207 = shalt.err (!%p2204_p4)
}
  0x15   :  { %s2382_s25 = smov 64   ;;  %s2383_s3 = smov 4  }
  0x16   :  { %s2982_s28 = sld [smem:[#allocation25_spill]]  ;;  %s2216_s4 = scalar_lea.vmem %s83_s24, 256 }
  0x17   :  { %p2217_p5 = scmp.ne.s32.totalorder %s83_s24, %s2216_s4  ;;  %p2221_p6 = scmp.lt.s32.totalorder %s83_s24, %s83_s24 }
  0x18   :  { %p2222_p7 = scmp.lt.s32.totalorder %s2216_s4, %s2216_s4 }
  0x1a   :  { %p2223_p8 = por %p2222_p7, %p2221_p6 }
  0x1c   :  { %56 = dma.hbm_to_vmem [thread:$0]  %s2982_s28, 1024, %s51_s22, [#allocation7], %s2382_s25, %s2382_s25, %s2383_s3  }
  0x1d   :  { %p2224_p9 = pnand %p2223_p8, %p2217_p5 }
  0x1f   :  { %2227 = shalt.err (!%p2224_p9)
}
  0x20   :  { %88 = dma.hbm_to_vmem [thread:$0]  %s2961_s7, 256, %s83_s24, [#allocation10], %s2382_s25, %s2382_s25, %s2383_s3  }
  0x21   :  { %s2384_s0 = smov [#allocation12]   ;;  %s2385_s1 = smov [#allocation3]  }
  0x22   :  { %s114_s21 = sshll.u32 %s2384_s0, 4  ;;  %s38_s23 = sshll.u32 %s2385_s1, 4  ;;  %s115_s21 = int_to_ptr.vmem [resolvable:$true] %s114_s21  ;;  %s39_s23 = int_to_ptr.vmem [resolvable:$true] %s38_s23 }
  0x23   :  { %s2236_s22 = scalar_lea.vmem %s115_s21, 256  ;;  %p2241_p11 = scmp.lt.s32.totalorder %s115_s21, %s115_s21 }
  0x24   :  { %p2237_p10 = scmp.ne.s32.totalorder %s115_s21, %s2236_s22  ;;  %p2242_p12 = scmp.lt.s32.totalorder %s2236_s22, %s2236_s22 }
  0x26   :  { %p2243_p13 = por %p2242_p12, %p2241_p11 }
  0x28   :  { %p2244_p0 = pnand %p2243_p13, %p2237_p10 }
  0x2a   :  { %2247 = shalt.err (!%p2244_p0)
}
  0x2b   :  { %120 = dma.hbm_to_vmem [thread:$0]  %s2967_s13, 256, %s115_s21, [#allocation13], %s2382_s25, %s2382_s25, %s2383_s3  }
  0x2c   :  { %s2256_s7 = scalar_lea.vmem %s39_s23, 128  ;;  %p2261_p2 = scmp.lt.s32.totalorder %s39_s23, %s39_s23 }
  0x2d   :  { %p2257_p1 = scmp.ne.s32.totalorder %s39_s23, %s2256_s7  ;;  %p2262_p3 = scmp.lt.s32.totalorder %s2256_s7, %s2256_s7 }
  0x2f   :  { %p2263_p4 = por %p2262_p3, %p2261_p2 }
  0x31   :  { %p2264_p5 = pnand %p2263_p4, %p2257_p1 }
  0x33   :  { %2267 = shalt.err (!%p2264_p5)
}
  0x34   :  { %s2983_s28 = sld [smem:[#allocation24_spill]]  ;;  %s2386_s4 = smov [#allocation8]  }
  0x35   :  { %s68_s29 = sshll.u32 %s2386_s4, 4  ;;  %s2387_s30 = smov [#allocation11]   ;;  %s69_s29 = int_to_ptr.vmem [resolvable:$true] %s68_s29 }
  0x36   :  { %s100_s0 = sshll.u32 %s2387_s30, 4  ;;  %s2276_s13 = scalar_lea.vmem %s69_s29, 256  ;;  %s101_s0 = int_to_ptr.vmem [resolvable:$true] %s100_s0 }
  0x37   :  { %p2277_p6 = scmp.ne.s32.totalorder %s69_s29, %s2276_s13  ;;  %p2281_p7 = scmp.lt.s32.totalorder %s69_s29, %s69_s29 }
  0x38   :  { %p2282_p8 = scmp.lt.s32.totalorder %s2276_s13, %s2276_s13 }
  0x3a   :  { %44 = dma.hbm_to_vmem [thread:$0]  %s2983_s28, 128, %s39_s23, [#allocation4], %s2382_s25, %s2382_s25, %s2383_s3  }
  0x3b   :  { %p2283_p9 = por %p2282_p8, %p2281_p7 }
  0x3d   :  { %p2284_p10 = pnand %p2283_p9, %p2277_p6 }
  0x3f   :  { %2287 = shalt.err (!%p2284_p10)
}
  0x40   :  { %74 = dma.hbm_to_vmem [thread:$0]  %s2959_s5, 256, %s69_s29, [#allocation7], %s2382_s25, %s2382_s25, %s2383_s3  }
  0x41   :  { %s2296_s23 = scalar_lea.vmem %s101_s0, 256  ;;  %p2301_p12 = scmp.lt.s32.totalorder %s101_s0, %s101_s0 }
  0x42   :  { %p2297_p11 = scmp.ne.s32.totalorder %s101_s0, %s2296_s23  ;;  %p2302_p13 = scmp.lt.s32.totalorder %s2296_s23, %s2296_s23 }
  0x44   :  { %p2303_p0 = por %p2302_p13, %p2301_p12 }
  0x46   :  { %p2304_p1 = pnand %p2303_p0, %p2297_p11 }
  0x48   :  { %2307 = shalt.err (!%p2304_p1)
}
  0x49   :  { %106 = dma.hbm_to_vmem [thread:$0]  %s2965_s11, 256, %s101_s0, [#allocation10], %s2382_s25, %s2382_s25, %s2383_s3  }
  0x4a   :  { %s2388_s26 = smov [#allocation14]  }
  0x4b   :  { %s128_s7 = sshll.u32 %s2388_s26, 4  ;;  %s129_s7 = int_to_ptr.vmem [resolvable:$true] %s128_s7 }
  0x4c   :  { %s2316_s24 = scalar_lea.vmem %s129_s7, 256  ;;  %p2321_p3 = scmp.lt.s32.totalorder %s129_s7, %s129_s7 }
  0x4d   :  { %p2317_p2 = scmp.ne.s32.totalorder %s129_s7, %s2316_s24  ;;  %p2322_p4 = scmp.lt.s32.totalorder %s2316_s24, %s2316_s24 }
  0x4f   :  { %p2323_p5 = por %p2322_p4, %p2321_p3 }
  0x51   :  { %p2324_p6 = pnand %p2323_p5, %p2317_p2 }
  0x53   :  { %2327 = shalt.err (!%p2324_p6)
}
  0x54   :  { %134 = dma.hbm_to_vmem [thread:$0]  %s2969_s15, 256, %s129_s7, [#allocation13], %s2382_s25, %s2382_s25, %s2383_s3  }
  0x55   :  { %2368 = dma.done.wait [#allocation4], 128  }
  0x56   :  { %2369 = vsyncadd [#allocation4], 4294967168 }
  0x57   :  { %2370 = dma.done.wait [#allocation7], 1280  }
  0x58   :  { %2371 = vsyncadd [#allocation7], 4294966016 }
  0x59   :  { %2372 = dma.done.wait [#allocation10], 512  }
  0x5a   :  { %2373 = vsyncadd [#allocation10], 4294966784 }
  0x5b   :  { %2374 = dma.done.wait [#allocation13], 512  }
  0x5c   :  { %2375 = vsyncadd [#allocation13], 4294966784  ;;  %v2389_v0 = vmov 0.0   ;;  %vm2390_vm0 = vmmov 0   ;;  %s2984_s4 = sld [smem:[#allocation27_spill]]  ;;  %v2081_v3 = vld [vmem:[#allocation3] sm:$0xff]   ;;  %v530_v34 = vlaneseq }
  0x5d   :  { %1986 = vmatprep.subr.bf16.mxu0 %v2389_v0  ;;  %1990 = vmatprep.mubr.msk.bf16.mxu0 %vm2390_vm0, %v2389_v0  ;;  %vm211_vm1 = vcmask 261120   ;;  %v2082_v4 = vld [vmem:[#allocation8 + $0x8] sm:$0xff]   ;;  %v2083_v5 = vld [vmem:[#allocation8] sm:$0xff]   ;;  %v2086_v8 = vld [vmem:[#allocation9 + $0x8] sm:$0xff]   ;;  %s2985_s30 = sld [smem:[#allocation28_spill]]  ;;  %vm1145_vm2 = vcmask 1041409  }
  0x5e   :  { %1994 = vmatprep.subr.bf16.mxu1 %v2082_v4  ;;  %v165_v6 = vld [vmem:[#allocation6] sm:$0xff]   ;;  %v167_v7 = vld [vmem:[#allocation6 + $0x8] sm:$0xff]   ;;  %v169_v9 = vld [vmem:[#allocation6 + $0x10] sm:$0xff]   ;;  %v2585_v36 = vshrl.u32 %v530_v34, 7  ;;  %v2391_v39 = vmov 1966171168  }
  0x5f   :  { %1995 = vmatpush3.bf16.msra.mxu1 %v2082_v4  ;;  %1998 = vmatprep.mubr.msk.bf16.mxu1 %vm211_vm1, %v165_v6  ;;  %v2089_v10 = vld [vmem:[#allocation9] sm:$0xff]   ;;  %v171_v11 = vld [vmem:[#allocation6 + $0x18] sm:$0xff]   ;;  %v173_v12 = vld [vmem:[#allocation6 + $0x20] sm:$0xff]   ;;  %v540_v40 = vunpack.c.l.s4 %v2391_v39  ;;  %s2986_s22 = sld [smem:[#allocation26_spill]]  ;;  %vm1147_vm3 = vcmask 1042434   ;;  %vm1149_vm4 = vcmask 1043459  }
  0x60   :  { %1996 = vmatprep.subr.bf16.mxu1 %v2083_v5  ;;  %v175_v13 = vld [vmem:[#allocation6 + $0x28] sm:$0xff]   ;;  %v177_v14 = vld [vmem:[#allocation6 + $0x30] sm:$0xff]   ;;  %v179_v15 = vld [vmem:[#allocation6 + $0x38] sm:$0xff]   ;;  %v2591_v42 = vsub.s32 0, %v2585_v36  ;;  %vm1151_vm5 = vcmask 1044484   ;;  %vm1153_vm6 = vcmask 1045509  }
  0x61   :  { %v2091_v25 = vld [vmem:[#allocation11 + $0x8] sm:$0xff]   ;;  %v2093_v27 = vld [vmem:[#allocation11] sm:$0xff]   ;;  %v528_v38 = vld [vmem:[%s2963_s9] sm:$0x1]  ;;  %v541_v45 = vunpack.c.0.s8 %v540_v40  ;;  %vm1155_vm7 = vcmask 1046534   ;;  %vm1157_vm8 = vcmask 1047559  }
  0x62   :  { %v2079_v1 = vld [vmem:[%s2984_s4 + $0x8] sm:$0xff]   ;;  %v2080_v2 = vld [vmem:[%s2984_s4] sm:$0xff]   ;;  %v529_v41 = vunpack.c.l.bf16 %v528_v38  ;;  %vm1168_vm9 = vcmask 64512   ;;  %vm1827_vm10 = vcmask 523264   ;;  %s2393_s21 = smov [#allocation16]  }
  0x63   :  { %1987 = vmatpush3.bf16.msra.mxu0 %v2079_v1  ;;  %1997 = vmatpush3.bf16.msra.mxu1 %v2083_v5  ;;  %v1910_v16 = vld [vmem:[%s2985_s30] ss:$0 sm:$0xff]  ;;  %v2605_v53 = vsub.s32 %v541_v45, %v2585_v36  ;;  %s1891_s1 = sshll.u32 %s2393_s21, 4  ;;  %s1892_s1 = int_to_ptr.vmem [resolvable:$true] %s1891_s1 }
  0x64   :  { %1988 = vmatprep.subr.bf16.mxu0 %v2389_v0  ;;  %2046 = vmatprep.subr.bf16.mxu1 %v2389_v0  ;;  %v1934_v43 = vld [vmem:[%s2962_s8] ss:$0 sm:$0xff]  ;;  %v533_v48 = vrot.slane %v529_v41, %v2591_v42  ;;  %p2333_p8 = scmp.lt.s32.totalorder %s1892_s1, %s1892_s1 }
  0x65   :  { %v2602_v51 = vld [vmem:[%s2960_s6] ss:$0 sm:$0xff] }
  0x66   :  { %1999 = vmatmul.mubr.msk.bf16.vlgmr.msra.gmra.mxu1 %vm211_vm1, %v167_v7 }
  0x67   :  { %1989 = vmatpush3.bf16.msra.mxu0 %v2080_v2  ;;  %2002 = vmatprep.mubr.msk.bf16.mxu1 %vm211_vm1, %v169_v9 }
  0x68   :  { %2014 = vmatprep.subr.bf16.mxu0 %v2389_v0 }
  0x6a   :  { %1991 = vmatmul.mubr.msk.bf16.vlgmr.msra.gmra.mxu0 %vm211_vm1, %v2081_v3 }
  0x6b   :  { %2018 = vmatprep.mubr.msk.bf16.mxu0 %vm2390_vm0, %v2389_v0  ;;  %2015 = vmatpush3.bf16.msra.mxu0 %v2086_v8 }
  0x6c   :  { %2016 = vmatprep.subr.bf16.mxu0 %v2389_v0 }
  0x6e   :  { %2003 = vmatmul.mubr.msk.bf16.gmra.mxu1 %vm211_vm1, %v171_v11 }
  0x6f   :  { %2017 = vmatpush3.bf16.msra.mxu0 %v2089_v10  ;;  %2006 = vmatprep.mubr.msk.bf16.mxu1 %vm211_vm1, %v173_v12 }
  0x70   :  { %2022 = vmatprep.subr.bf16.mxu0 %v2389_v0 }
  0x76   :  { %2007 = vmatmul.mubr.msk.bf16.gmra.mxu1 %vm211_vm1, %v175_v13 }
  0x77   :  { %2010 = vmatprep.mubr.msk.bf16.mxu1 %vm211_vm1, %v177_v14 }
  0x7e   :  { %2011 = vmatmul.mubr.msk.bf16.gmra.mxu1 %vm211_vm1, %v179_v15 }
  0x7f   :  { %2054 = vmatprep.mubr.msk.bf16.mxu1 %vm2390_vm0, %v2389_v0 }
 0x126   :  { %v2000_v28 = vpop.f32.mrf.mxu1 }
 0x127   :  { %v388_v57 = vadd.f32 %v2000_v28, %v2602_v51 }
 0x128   :  { %v379_v29 = vpop.f32.mrf.mxu1 }
 0x129   :  { %v380_v58 = vadd.f32 %v2602_v51, %v379_v29  ;;  %v444_v6 = vmax.f32 %v388_v57, 0.0 }
 0x12a   :  { %v249_v17 = vpop.f32.mrf.mxu0  ;;  %v2001_v30 = vpop.f32.mrf.mxu1 }
 0x12b   :  { %v250_v18 = vadd.f32 %v1910_v16, %v249_v17  ;;  %v391_v61 = vadd.f32 %v2001_v30, %v2602_v51  ;;  %v442_v11 = vmax.f32 %v380_v58, 0.0 }
 0x12c   :  { %v1992_v19 = vpop.f32.mrf.mxu0  ;;  %v382_v31 = vpop.f32.mrf.mxu1 }
 0x12d   :  { %2112 = vtanh.f32 %v250_v18  ;;  %v383_v3 = vadd.f32 %v2602_v51, %v382_v31  ;;  %v445_v12 = vmax.f32 %v391_v61, 0.0 }
 0x12e   :  { %v252_v20 = vpop.f32.mrf.mxu0  ;;  %v2004_v32 = vpop.f32.mrf.mxu1 }
 0x12f   :  { %v253_v21 = vadd.f32 %v1910_v16, %v252_v20  ;;  %v443_v20 = vmax.f32 %v383_v3, 0.0 }
 0x130   :  { %v1993_v22 = vpop.f32.mrf.mxu0  ;;  %v395_v33 = vpop.f32.mrf.mxu1 }
 0x131   :  { %2114 = vtanh.f32 %v253_v21  ;;  %v396_v13 = vadd.f32 %v2602_v51, %v395_v33  ;;  %v404_v21 = vadd.f32 %v2004_v32, %v2602_v51 }
 0x132   :  { %v2582_v35 = vpop.f32.mrf.mxu1 }
 0x133   :  { %v446_v30 = vmax.f32 %v396_v13, 0.0 }
 0x134   :  { %v398_v37 = vpop.f32.mrf.mxu1 }
 0x135   :  { %v399_v22 = vadd.f32 %v2602_v51, %v398_v37 }
 0x136   :  { %v2596_v44 = vpop.f32.mrf.mxu1 }
 0x137   :  { %v447_v41 = vmax.f32 %v399_v22, 0.0 }
 0x138   :  { %v411_v50 = vpop.f32.mrf.mxu1 }
 0x13a   :  { %v2113_v23 = vpop.eup %2112  ;;  %v2609_v59 = vpop.f32.mrf.mxu1 }
 0x13c   :  { %v414_v8 = vpop.f32.mrf.mxu1 }
 0x13e   :  { %v2115_v24 = vpop.eup %2114 }
 0x13f   :  { %v458_v26 = vpack.c.bf16 %v2115_v24, %v2113_v23 }
 0x141   :  { %2019 = vmatmul.mubr.msk.bf16.vlgmr.msra.gmra.mxu0 %vm211_vm1, %v458_v26 }
 0x142   :  { %2023 = vmatpush3.bf16.msra.mxu0 %v2091_v25  ;;  %2026 = vmatprep.mubr.msk.bf16.mxu0 %vm2390_vm0, %v2389_v0  ;;  %v2628_v25 = vpop.f32.mrf.mxu1 }
 0x143   :  { %2024 = vmatprep.subr.bf16.mxu0 %v2389_v0 }
 0x146   :  { %2025 = vmatpush3.bf16.msra.mxu0 %v2093_v27 }
 0x147   :  { %2030 = vmatprep.subr.bf16.mxu0 %v2389_v0 }
 0x149   :  { %2027 = vmatmul.mubr.msk.bf16.vlgmr.msra.gmra.mxu0 %vm211_vm1, %v458_v26 }
 0x14a   :  { %2034 = vmatprep.mubr.msk.bf16.mxu0 %vm2390_vm0, %v2389_v0 }
 0x201   :  { %v519_v46 = vpop.f32.mrf.mxu0 }
 0x202   :  { %v520_v47 = vadd.f32 %v1934_v43, %v519_v46 }
 0x203   :  { %v2020_v49 = vpop.f32.mrf.mxu0 }
 0x204   :  { %v526_v52 = vmax.f32 %v520_v47, 0.0  ;;  %v427_v47 = vpop.f32.mrf.mxu1 }
 0x205   :  { %v522_v54 = vpop.f32.mrf.mxu0 }
 0x206   :  { %v534_v55 = vmul.f32 %v533_v48, %v526_v52  ;;  %v523_v56 = vadd.f32 %v1934_v43, %v522_v54  ;;  %v448_v54 = vmax.f32 %v404_v21, 0.0  ;;  %v2013_v3 = vpop.f32.mrf.mxu1  ;;  %v428_v21 = vadd.f32 %v2602_v51, %v427_v47 }
 0x207   :  { %v2021_v60 = vpop.f32.mrf.mxu0 }
 0x208   :  { %v538_v62 = vcombine.high %v534_v55, %v534_v55  ;;  %v545_v63 = vrot.slane %v534_v55, %v2605_v53  ;;  %v527_v1 = vmax.f32 %v523_v56, 0.0  ;;  %v407_v55 = vadd.f32 %v2582_v35, %v2602_v51 }
 0x209   :  { %v2613_v2 = vpop.f32.mrf.mxu0  ;;  %v412_v56 = vadd.f32 %v2602_v51, %v411_v50 }
 0x20a   :  { %v552_v4 = vrot.slane %v538_v62, %v2605_v53  ;;  %v553_v5 = vcombine.high %v545_v63, %v545_v63  ;;  %v535_v7 = vmul.f32 %v533_v48, %v527_v1  ;;  %v561_v10 = vrot.slane %v545_v63, %v2605_v53 }
 0x20b   :  { %v2028_v9 = vpop.f32.mrf.mxu0  ;;  %v415_v62 = vadd.f32 %v2602_v51, %v414_v8 }
 0x20c   :  { %v575_v14 = vrot.slane %v553_v5, %v2605_v53  ;;  %v639_v16 = vrot.slane %v561_v10, %v2591_v42  ;;  %v583_v17 = vcombine.high %v561_v10, %v561_v10  ;;  %v568_v18 = vrot.slane %v552_v4, %v2605_v53 }
 0x20d   :  { %v2620_v15 = vpop.f32.mrf.mxu0  ;;  %v554_v19 = vcombine.high %v552_v4, %v552_v4  ;;  %v594_v24 = vrot.slane %v535_v7, %v2605_v53  ;;  %v587_v43 = vcombine.high %v535_v7, %v535_v7  ;;  %v449_v5 = vmax.f32 %v407_v55, 0.0 }
 0x20e   :  { %v643_v23 = vrot.slane %v575_v14, %v2591_v42  ;;  %v716_v27 = vmul.f32 %v639_v16, %v442_v11  ;;  %v647_v28 = vrot.slane %v583_v17, %v2591_v42  ;;  %v585_v29 = vcombine.high %v575_v14, %v575_v14  ;;  %v430_v16 = vpop.f32.mrf.mxu1 }
 0x20f   :  { %v2029_v26 = vpop.f32.mrf.mxu0  ;;  %v655_v33 = vrot.slane %v568_v18, %v2591_v42  ;;  %v582_v38 = vrot.slane %v554_v19, %v2605_v53  ;;  %v584_v40 = vcombine.high %v568_v18, %v568_v18  ;;  %v602_v46 = vcombine.high %v594_v24, %v594_v24 }
 0x210   :  { %v717_v31 = vmul.f32 %v643_v23, %v443_v20  ;;  %v732_v32 = vsel %vm211_vm1, %v716_v27, 0.0  ;;  %v718_v37 = vmul.f32 %v647_v28, %v444_v6  ;;  %v651_v39 = vrot.slane %v585_v29, %v2591_v42 }
 0x211   :  { %733 = vadd.xlane.f32.xlu0 %v732_v32  ;;  %v659_v45 = vrot.slane %v582_v38, %v2591_v42  ;;  %v586_v52 = vcombine.high %v582_v38, %v582_v38  ;;  %v720_v58 = vmul.f32 %v655_v33, %v446_v30  ;;  %v663_v60 = vrot.slane %v584_v40, %v2591_v42 }
 0x212   :  { %v738_v48 = vsel %vm211_vm1, %v718_v37, 0.0  ;;  %v719_v49 = vmul.f32 %v651_v39, %v445_v12  ;;  %v735_v57 = vsel %vm211_vm1, %v717_v31, 0.0  ;;  %v610_v61 = vrot.slane %v594_v24, %v2605_v53 }
 0x213   :  { %739 = vadd.xlane.f32.xlu1 %v738_v48  ;;  %v721_v63 = vmul.f32 %v659_v45, %v447_v41  ;;  %v601_v1 = vrot.slane %v587_v43, %v2605_v53  ;;  %v667_v35 = vrot.slane %v586_v52, %v2591_v42  ;;  %v624_v50 = vrot.slane %v602_v46, %v2605_v53 }
 0x214   :  { %v741_v4 = vsel %vm211_vm1, %v719_v49, 0.0  ;;  %v420_v6 = vadd.f32 %v2596_v44, %v2602_v51  ;;  %v450_v7 = vmax.f32 %v412_v56, 0.0  ;;  %v744_v9 = vsel %vm211_vm1, %v720_v58, 0.0 }
 0x215   :  { %736 = vadd.xlane.f32.xlu0 %v735_v57  ;;  %v722_v8 = vmul.f32 %v663_v60, %v448_v54  ;;  %v671_v10 = vrot.slane %v610_v61, %v2591_v42  ;;  %v632_v11 = vcombine.high %v610_v61, %v610_v61  ;;  %v423_v12 = vadd.f32 %v2609_v59, %v2602_v51 }
 0x216   :  { %v451_v13 = vmax.f32 %v415_v62, 0.0  ;;  %v747_v14 = vsel %vm211_vm1, %v721_v63, 0.0  ;;  %v723_v17 = vmul.f32 %v667_v35, %v449_v5  ;;  %v675_v18 = vrot.slane %v624_v50, %v2591_v42  ;;  %v182_v35 = vld [vmem:[%s2986_s22 + $0x8] sm:$0xff] }
 0x217   :  { %742 = vadd.xlane.f32.xlu1 %v741_v4  ;;  %v634_v44 = vcombine.high %v624_v50, %v624_v50  ;;  %v603_v19 = vcombine.high %v601_v1, %v601_v1  ;;  %v452_v20 = vmax.f32 %v420_v6, 0.0  ;;  %v750_v22 = vsel %vm211_vm1, %v722_v8, 0.0 }
 0x218   :  { %v724_v23 = vmul.f32 %v671_v10, %v450_v7  ;;  %v679_v24 = vrot.slane %v632_v11, %v2591_v42  ;;  %v617_v59 = vrot.slane %v601_v1, %v2605_v53  ;;  %v453_v26 = vmax.f32 %v423_v12, 0.0 }
 0x219   :  { %745 = vadd.xlane.f32.xlu0 %v744_v9  ;;  %v431_v27 = vadd.f32 %v2602_v51, %v430_v16  ;;  %v753_v28 = vsel %vm211_vm1, %v723_v17, 0.0  ;;  %v725_v29 = vmul.f32 %v675_v18, %v451_v13  ;;  %v683_v30 = vrot.slane %v634_v44, %v2591_v42 }
 0x21a   :  { %v631_v31 = vrot.slane %v603_v19, %v2605_v53  ;;  %v436_v33 = vadd.f32 %v2628_v25, %v2602_v51  ;;  %v454_v38 = vmax.f32 %v428_v21, 0.0  ;;  %v756_v32 = vsel %vm211_vm1, %v724_v23, 0.0 }
 0x21b   :  { %748 = vadd.xlane.f32.xlu1 %v747_v14  ;;  %v726_v37 = vmul.f32 %v679_v24, %v452_v20  ;;  %v687_v39 = vrot.slane %v617_v59, %v2591_v42  ;;  %v633_v40 = vcombine.high %v617_v59, %v617_v59  ;;  %v439_v41 = vadd.f32 %v2013_v3, %v2602_v51  ;;  %v181_v3 = vld [vmem:[%s2986_s22] sm:$0xff] }
 0x21c   :  { %v455_v43 = vmax.f32 %v431_v27, 0.0  ;;  %v759_v45 = vsel %vm211_vm1, %v725_v29, 0.0  ;;  %v727_v46 = vmul.f32 %v683_v30, %v453_v26  ;;  %v691_v53 = vrot.slane %v631_v31, %v2591_v42 }
 0x21d   :  { %751 = vadd.xlane.f32.xlu0 %v750_v22  ;;  %v635_v47 = vcombine.high %v631_v31, %v631_v31  ;;  %v456_v25 = vmax.f32 %v436_v33, 0.0  ;;  %v762_v48 = vsel %vm211_vm1, %v726_v37, 0.0  ;;  %v728_v49 = vmul.f32 %v687_v39, %v454_v38 }
 0x21e   :  { %v695_v52 = vrot.slane %v633_v40, %v2591_v42  ;;  %v457_v54 = vmax.f32 %v439_v41, 0.0  ;;  %v765_v55 = vsel %vm211_vm1, %v727_v46, 0.0  ;;  %v729_v51 = vmul.f32 %v691_v53, %v455_v43 }
 0x21f   :  { %754 = vadd.xlane.f32.xlu1 %v753_v28  ;;  %v699_v56 = vrot.slane %v635_v47, %v2591_v42  ;;  %v768_v57 = vsel %vm211_vm1, %v728_v49, 0.0  ;;  %v2680_v1 = vsub.s32 1, %v2585_v36  ;;  %v874_v50 = vrot.slane %v181_v3, %v2591_v42 }
 0x220   :  { %v730_v58 = vmul.f32 %v695_v52, %v456_v25  ;;  %v771_v60 = vsel %vm211_vm1, %v729_v51, 0.0  ;;  %v2691_v5 = vsub.s32 2, %v2585_v36  ;;  %v930_v6 = vrot.slane %v182_v35, %v2591_v42 }
 0x221   :  { %757 = vadd.xlane.f32.xlu0 %v756_v32  ;;  %v731_v61 = vmul.f32 %v699_v56, %v457_v54  ;;  %v881_v4 = vrot.slane %v181_v3, %v2680_v1  ;;  %v2696_v9 = vsub.s32 3, %v2585_v36  ;;  %v937_v8 = vrot.slane %v182_v35, %v2680_v1 }
 0x222   :  { %v774_v62 = vsel %vm211_vm1, %v730_v58, 0.0  ;;  %v888_v7 = vrot.slane %v181_v3, %v2691_v5  ;;  %v2701_v11 = vsub.s32 4, %v2585_v36  ;;  %v944_v12 = vrot.slane %v182_v35, %v2691_v5 }
 0x223   :  { %760 = vadd.xlane.f32.xlu1 %v759_v45  ;;  %v777_v63 = vsel %vm211_vm1, %v731_v61, 0.0  ;;  %v895_v10 = vrot.slane %v181_v3, %v2696_v9  ;;  %v2706_v14 = vsub.s32 5, %v2585_v36  ;;  %v951_v16 = vrot.slane %v182_v35, %v2696_v9 }
 0x224   :  { %v902_v13 = vrot.slane %v181_v3, %v2701_v11  ;;  %v2711_v18 = vsub.s32 6, %v2585_v36  ;;  %v958_v44 = vrot.slane %v182_v35, %v2701_v11  ;;  %v2716_v20 = vsub.s32 7, %v2585_v36 }
 0x225   :  { %763 = vadd.xlane.f32.xlu0 %v762_v48  ;;  %v909_v17 = vrot.slane %v181_v3, %v2706_v14  ;;  %v965_v21 = vrot.slane %v182_v35, %v2706_v14  ;;  %v2392_v27 = vmov 0   ;;  %v781_v40 = vstv %s2964_s10 }
 0x226   :  { %v916_v19 = vrot.slane %v181_v3, %v2711_v18  ;;  %v923_v22 = vrot.slane %v181_v3, %v2716_v20  ;;  %v972_v23 = vrot.slane %v182_v35, %v2711_v18  ;;  %v979_v24 = vrot.slane %v182_v35, %v2716_v20  ;;  %2078 = vset.pattern.permute.xlu1 %v2392_v27 }
 0x227   :  { %766 = vadd.xlane.f32.xlu1 %v765_v55  ;;  %2077 = vset.pattern.permute.xlu0 %v2392_v27 }
 0x229   :  { %769 = vadd.xlane.f32.xlu0 %v768_v57 }
 0x22b   :  { %772 = vadd.xlane.f32.xlu1 %v771_v60 }
 0x22d   :  { %775 = vadd.xlane.f32.xlu0 %v774_v62 }
 0x22f   :  { %778 = vadd.xlane.f32.xlu1 %v777_v63 }
 0x240   :  { %883 = vbcast.lane.b32.xlu1 %v881_v4, 256 }
 0x243   :  { %876 = vbcast.lane.b32.xlu0 %v874_v50, 256 }
 0x244   :  { %932 = vbcast.lane.b32.xlu1 %v930_v6, 256 }
 0x247   :  { %890 = vbcast.lane.b32.xlu0 %v888_v7, 256 }
 0x248   :  { %939 = vbcast.lane.b32.xlu1 %v937_v8, 256 }
 0x24b   :  { %897 = vbcast.lane.b32.xlu0 %v895_v10, 256 }
 0x24c   :  { %946 = vbcast.lane.b32.xlu1 %v944_v12, 256 }
 0x24f   :  { %904 = vbcast.lane.b32.xlu0 %v902_v13, 256 }
 0x250   :  { %953 = vbcast.lane.b32.xlu1 %v951_v16, 256 }
 0x253   :  { %911 = vbcast.lane.b32.xlu0 %v909_v17, 256 }
 0x254   :  { %960 = vbcast.lane.b32.xlu1 %v958_v44, 256 }
 0x257   :  { %918 = vbcast.lane.b32.xlu0 %v916_v19, 256 }
 0x258   :  { %967 = vbcast.lane.b32.xlu1 %v965_v21, 256 }
 0x25b   :  { %925 = vbcast.lane.b32.xlu0 %v923_v22, 256 }
 0x25c   :  { %974 = vbcast.lane.b32.xlu1 %v972_v23, 256 }
 0x260   :  { %981 = vbcast.lane.b32.xlu1 %v979_v24, 256 }
 0x29a   :  { %v734_v59 = vpop.xlane.xlu0 %733 }
 0x29b   :  { %v782_v49 = vadd.f32 %v781_v40, %v734_v59 }
 0x29c   :  { %v740_v26 = vpop.xlane.xlu1 %739 }
 0x29d   :  { %v784_v52 = vadd.f32 %v781_v40, %v740_v26 }
 0x29e   :  { %v737_v28 = vpop.xlane.xlu0 %736 }
 0x29f   :  { %v783_v47 = vadd.f32 %v781_v40, %v737_v28 }
 0x2a0   :  { %v743_v29 = vpop.xlane.xlu1 %742 }
 0x2a1   :  { %v785_v54 = vadd.f32 %v781_v40, %v743_v29 }
 0x2a2   :  { %v746_v30 = vpop.xlane.xlu0 %745 }
 0x2a3   :  { %v2727_v45 = vadd.f32 %v781_v40, %v746_v30 }
 0x2a4   :  { %v749_v31 = vpop.xlane.xlu1 %748 }
 0x2a5   :  { %v2725_v43 = vadd.f32 %v781_v40, %v749_v31  ;;  %v798_v61 = vmax.f32 %v782_v49, %v2727_v45 }
 0x2a6   :  { %v752_v33 = vpop.xlane.xlu0 %751 }
 0x2a7   :  { %v2729_v46 = vadd.f32 %v781_v40, %v752_v33  ;;  %v799_v56 = vmax.f32 %v783_v47, %v2725_v43 }
 0x2a8   :  { %v755_v38 = vpop.xlane.xlu1 %754 }
 0x2a9   :  { %v2731_v25 = vadd.f32 %v781_v40, %v755_v38  ;;  %v800_v62 = vmax.f32 %v784_v52, %v2729_v46 }
 0x2aa   :  { %v758_v32 = vpop.xlane.xlu0 %757 }
 0x2ab   :  { %v790_v55 = vadd.f32 %v781_v40, %v758_v32  ;;  %v801_v3 = vmax.f32 %v785_v54, %v2731_v25 }
 0x2ac   :  { %v761_v37 = vpop.xlane.xlu1 %760 }
 0x2ad   :  { %v791_v48 = vadd.f32 %v781_v40, %v761_v37  ;;  %v802_v6 = vmax.f32 %v798_v61, %v790_v55 }
 0x2ae   :  { %v764_v39 = vpop.xlane.xlu0 %763 }
 0x2af   :  { %v792_v57 = vadd.f32 %v781_v40, %v764_v39  ;;  %v803_v4 = vmax.f32 %v799_v56, %v791_v48 }
 0x2b0   :  { %v767_v41 = vpop.xlane.xlu1 %766 }
 0x2b1   :  { %v793_v58 = vadd.f32 %v781_v40, %v767_v41  ;;  %v804_v8 = vmax.f32 %v800_v62, %v792_v57 }
 0x2b2   :  { %v770_v53 = vpop.xlane.xlu0 %769 }
 0x2b3   :  { %v794_v35 = vadd.f32 %v781_v40, %v770_v53  ;;  %v805_v10 = vmax.f32 %v801_v3, %v793_v58 }
 0x2b4   :  { %v773_v51 = vpop.xlane.xlu1 %772 }
 0x2b5   :  { %v2734_v60 = vadd.f32 %v781_v40, %v773_v51  ;;  %v806_v16 = vmax.f32 %v802_v6, %v794_v35 }
 0x2b6   :  { %v776_v63 = vpop.xlane.xlu0 %775 }
 0x2b7   :  { %v2739_v50 = vadd.f32 %v781_v40, %v776_v63  ;;  %v807_v12 = vmax.f32 %v803_v4, %v2734_v60 }
 0x2b8   :  { %v779_v7 = vpop.xlane.xlu1 %778 }
 0x2b9   :  { %v2742_v13 = vadd.f32 %v781_v40, %v779_v7  ;;  %v808_v17 = vmax.f32 %v804_v8, %v2739_v50  ;;  %v810_v19 = vmax.f32 %v806_v16, %v807_v12 }
 0x2ba   :  { %v877_v62 = vpop.permute.xlu0 %876 }
 0x2bb   :  { %v809_v44 = vmax.f32 %v805_v10, %v2742_v13 }
 0x2bc   :  { %v884_v30 = vpop.permute.xlu1 %883 }
 0x2bd   :  { %v811_v21 = vmax.f32 %v808_v17, %v809_v44 }
 0x2be   :  { %v891_v6 = vpop.permute.xlu0 %890 }
 0x2bf   :  { %v812_v22 = vmax.f32 %v810_v19, %v811_v21 }
 0x2c0   :  { %v933_v39 = vpop.permute.xlu1 %932 }
 0x2c1   :  { %v813_v23 = vrot.slane %v812_v22, 4 }
 0x2c3   :  { %v814_v24 = vmax.f32 %v812_v22, %v813_v23 }
 0x2c5   :  { %v815_v59 = vrot.slane %v814_v24, 2 }
 0x2c7   :  { %v816_v26 = vmax.f32 %v814_v24, %v815_v59 }
 0x2c9   :  { %v817_v27 = vrot.slane %v816_v26, 1 }
 0x2cb   :  { %v818_v28 = vmax.f32 %v816_v26, %v817_v27 }
 0x2cd   :  { %2058 = vpush %v818_v28 }
 0x2fe   :  { %s2059_s10 = spop %2058 }
 0x2ff   :  { %v2746_v29 = vstv %s2059_s10 }
 0x300   :  { %v821_v31 = vsub.f32 %v782_v49, %v2746_v29  ;;  %v822_v33 = vsub.f32 %v783_v47, %v2746_v29  ;;  %v829_v38 = vsub.f32 %v790_v55, %v2746_v29  ;;  %v830_v32 = vsub.f32 %v791_v48, %v2746_v29  ;;  %v940_v47 = vpop.permute.xlu1 %939 }
 0x301   :  { %v831_v53 = vsub.f32 %v792_v57, %v2746_v29  ;;  %v823_v56 = vsub.f32 %v784_v52, %v2746_v29  ;;  %v832_v61 = vsub.f32 %v793_v58, %v2746_v29  ;;  %v824_v55 = vsub.f32 %v785_v54, %v2746_v29 }
 0x302   :  { %v837_v37 = vmul.f32 1.442695, %v821_v31  ;;  %v839_v40 = vmul.f32 1.442695, %v822_v33  ;;  %v853_v41 = vmul.f32 1.442695, %v829_v38  ;;  %v833_v3 = vsub.f32 %v794_v35, %v2746_v29 }
 0x303   :  { %v855_v51 = vmul.f32 1.442695, %v830_v32  ;;  %v857_v49 = vmul.f32 1.442695, %v831_v53  ;;  %v841_v48 = vmul.f32 1.442695, %v823_v56  ;;  %v825_v52 = vsub.f32 %v2727_v45, %v2746_v29 }
 0x304   :  { %2116 = vpow2.f32 %v837_v37  ;;  %v859_v63 = vmul.f32 1.442695, %v832_v61  ;;  %v843_v57 = vmul.f32 1.442695, %v824_v55  ;;  %v947_v4 = vpop.permute.xlu1 %946  ;;  %v861_v58 = vmul.f32 1.442695, %v833_v3 }
 0x305   :  { %2118 = vpow2.f32 %v839_v40  ;;  %v834_v7 = vsub.f32 %v2734_v60, %v2746_v29  ;;  %v845_v54 = vmul.f32 1.442695, %v825_v52  ;;  %v826_v8 = vsub.f32 %v2725_v43, %v2746_v29  ;;  %v898_v43 = vpop.permute.xlu0 %897 }
 0x306   :  { %2120 = vpow2.f32 %v853_v41  ;;  %v835_v45 = vsub.f32 %v2739_v50, %v2746_v29  ;;  %v827_v60 = vsub.f32 %v2729_v46, %v2746_v29  ;;  %v836_v50 = vsub.f32 %v2742_v13, %v2746_v29 }
 0x307   :  { %2122 = vpow2.f32 %v855_v51  ;;  %v863_v12 = vmul.f32 1.442695, %v834_v7  ;;  %v847_v19 = vmul.f32 1.442695, %v826_v8  ;;  %v828_v46 = vsub.f32 %v2731_v25, %v2746_v29 }
 0x308   :  { %2124 = vpow2.f32 %v857_v49  ;;  %v954_v44 = vpop.permute.xlu1 %953  ;;  %v865_v23 = vmul.f32 1.442695, %v835_v45  ;;  %v849_v26 = vmul.f32 1.442695, %v827_v60  ;;  %v867_v33 = vmul.f32 1.442695, %v836_v50 }
 0x309   :  { %2126 = vpow2.f32 %v841_v48  ;;  %v905_v31 = vpop.permute.xlu0 %904  ;;  %v851_v32 = vmul.f32 1.442695, %v828_v46 }
 0x30a   :  { %2128 = vpow2.f32 %v859_v63 }
 0x30b   :  { %2130 = vpow2.f32 %v843_v57 }
 0x30c   :  { %2132 = vpow2.f32 %v861_v58 }
 0x30d   :  { %2134 = vpow2.f32 %v845_v54  ;;  %v912_v51 = vpop.permute.xlu0 %911 }
 0x30e   :  { %2136 = vpow2.f32 %v863_v12 }
 0x30f   :  { %2138 = vpow2.f32 %v847_v19 }
 0x310   :  { %2140 = vpow2.f32 %v865_v23 }
 0x311   :  { %v2117_v10 = vpop.eup %2116  ;;  %2142 = vpow2.f32 %v849_v26 }
 0x312   :  { %v2119_v35 = vpop.eup %2118  ;;  %v2765_v16 = vmul.f32 %v2117_v10, %v877_v62  ;;  %2144 = vpow2.f32 %v867_v33  ;;  %v919_v62 = vpop.permute.xlu0 %918 }
 0x313   :  { %v2121_v17 = vpop.eup %2120  ;;  %v2769_v21 = vmul.f32 %v2119_v35, %v884_v30  ;;  %v961_v30 = vpop.permute.xlu1 %960  ;;  %2146 = vpow2.f32 %v851_v32 }
 0x314   :  { %v2123_v22 = vpop.eup %2122  ;;  %1032 = vperm.xlu0 %2077, %v2765_v16   ;;  %v2779_v27 = vmul.f32 %v2121_v17, %v933_v39 }
 0x315   :  { %1035 = vperm.xlu1 %2078, %v2769_v21   ;;  %v2775_v24 = vmul.f32 %v2123_v22, %v940_v47  ;;  %v2125_v59 = vpop.eup %2124 }
 0x316   :  { %v2127_v28 = vpop.eup %2126  ;;  %v2783_v13 = vmul.f32 %v2125_v59, %v947_v4  ;;  %v926_v54 = vpop.permute.xlu0 %925 }
 0x317   :  { %v2129_v38 = vpop.eup %2128  ;;  %v2785_v37 = vmul.f32 %v2127_v28, %v891_v6  ;;  %v968_v41 = vpop.permute.xlu1 %967 }
 0x318   :  { %1059 = vperm.xlu0 %2077, %v2775_v24   ;;  %v2131_v40 = vpop.eup %2130  ;;  %v2789_v25 = vmul.f32 %v2129_v38, %v954_v44 }
 0x319   :  { %1056 = vperm.xlu1 %2078, %v2779_v27   ;;  %v2133_v29 = vpop.eup %2132  ;;  %v2791_v39 = vmul.f32 %v2131_v40, %v898_v43  ;;  %v1080_v43 = vand.u32 127, %v530_v34 }
 0x31a   :  { %v2135_v53 = vpop.eup %2134  ;;  %v2795_v56 = vmul.f32 %v2133_v29, %v961_v30 }
 0x31b   :  { %v2137_v61 = vpop.eup %2136  ;;  %v2797_v49 = vmul.f32 %v2135_v53, %v905_v31  ;;  %v975_v55 = vpop.permute.xlu1 %974  ;;  %v1083_v59 = vsub.s32 %v1080_v43, %v2585_v36 }
 0x31c   :  { %1062 = vperm.xlu0 %2077, %v2783_v13   ;;  %v2139_v47 = vpop.eup %2138  ;;  %v2801_v48 = vmul.f32 %v2137_v61, %v968_v41 }
 0x31d   :  { %1038 = vperm.xlu1 %2078, %v2785_v37   ;;  %v2141_v63 = vpop.eup %2140  ;;  %v2803_v3 = vmul.f32 %v2139_v47, %v912_v51 }
 0x31e   :  { %v2143_v57 = vpop.eup %2142  ;;  %v2807_v52 = vmul.f32 %v2141_v63, %v975_v55 }
 0x31f   :  { %v2145_v4 = vpop.eup %2144  ;;  %v2809_v6 = vmul.f32 %v2143_v57, %v919_v62  ;;  %v982_v58 = vpop.permute.xlu1 %981 }
 0x320   :  { %1065 = vperm.xlu0 %2077, %v2789_v25   ;;  %v2147_v7 = vpop.eup %2146  ;;  %v2813_v8 = vmul.f32 %v2145_v4, %v982_v58 }
 0x321   :  { %1041 = vperm.xlu1 %2078, %v2791_v39   ;;  %v2815_v10 = vmul.f32 %v2147_v7, %v926_v54 }
 0x324   :  { %1068 = vperm.xlu0 %2077, %v2795_v56  }
 0x325   :  { %1044 = vperm.xlu1 %2078, %v2797_v49  }
 0x328   :  { %1071 = vperm.xlu0 %2077, %v2801_v48  }
 0x329   :  { %1047 = vperm.xlu1 %2078, %v2803_v3  }
 0x32c   :  { %1074 = vperm.xlu0 %2077, %v2807_v52  }
 0x32d   :  { %1050 = vperm.xlu1 %2078, %v2809_v6  }
 0x330   :  { %1077 = vperm.xlu0 %2077, %v2813_v8  }
 0x331   :  { %1053 = vperm.xlu1 %2078, %v2815_v10  }
 0x38f   :  { %v1033_v35 = vpop.permute.xlu0 %1032 }
 0x390   :  { %v1036_v12 = vpop.permute.xlu1 %1035  ;;  %v1084_v31 = vrot.slane %v1033_v35, %v1083_v59 }
 0x391   :  { %v1088_v33 = vrot.slane %v1036_v12, %v1083_v59 }
 0x393   :  { %v1060_v45 = vpop.permute.xlu0 %1059  ;;  %v1146_v47 = vsel %vm1145_vm2, %v1088_v33, %v1084_v31 }
 0x394   :  { %v1057_v17 = vpop.permute.xlu1 %1056  ;;  %v1120_v46 = vrot.slane %v1060_v45, %v1083_v59 }
 0x395   :  { %v1116_v28 = vrot.slane %v1057_v17, %v1083_v59 }
 0x397   :  { %v1063_v44 = vpop.permute.xlu0 %1062  ;;  %v1159_v53 = vsel %vm1145_vm2, %v1120_v46, %v1116_v28 }
 0x398   :  { %v1039_v19 = vpop.permute.xlu1 %1038  ;;  %v1124_v38 = vrot.slane %v1063_v44, %v1083_v59 }
 0x399   :  { %v1092_v32 = vrot.slane %v1039_v19, %v1083_v59 }
 0x39a   :  { %v1160_v55 = vsel %vm1147_vm3, %v1124_v38, %v1159_v53 }
 0x39b   :  { %v1066_v60 = vpop.permute.xlu0 %1065  ;;  %v1148_v57 = vsel %vm1147_vm3, %v1092_v32, %v1146_v47 }
 0x39c   :  { %v1042_v22 = vpop.permute.xlu1 %1041  ;;  %v1128_v40 = vrot.slane %v1066_v60, %v1083_v59 }
 0x39d   :  { %v1096_v29 = vrot.slane %v1042_v22, %v1083_v59 }
 0x39e   :  { %v1161_v4 = vsel %vm1149_vm4, %v1128_v40, %v1160_v55 }
 0x39f   :  { %v1069_v23 = vpop.permute.xlu0 %1068  ;;  %v1150_v7 = vsel %vm1149_vm4, %v1096_v29, %v1148_v57 }
 0x3a0   :  { %v1045_v50 = vpop.permute.xlu1 %1044  ;;  %v1132_v41 = vrot.slane %v1069_v23, %v1083_v59 }
 0x3a1   :  { %v1100_v51 = vrot.slane %v1045_v50, %v1083_v59 }
 0x3a2   :  { %v1162_v54 = vsel %vm1151_vm5, %v1132_v41, %v1161_v4 }
 0x3a3   :  { %v1072_v26 = vpop.permute.xlu0 %1071  ;;  %v1152_v12 = vsel %vm1151_vm5, %v1100_v51, %v1150_v7 }
 0x3a4   :  { %v1048_v30 = vpop.permute.xlu1 %1047  ;;  %v1136_v36 = vrot.slane %v1072_v26, %v1083_v59 }
 0x3a5   :  { %v1104_v62 = vrot.slane %v1048_v30, %v1083_v59 }
 0x3a6   :  { %v1163_v45 = vsel %vm1153_vm6, %v1136_v36, %v1162_v54 }
 0x3a7   :  { %v1075_v34 = vpop.permute.xlu0 %1074  ;;  %v1154_v19 = vsel %vm1153_vm6, %v1104_v62, %v1152_v12 }
 0x3a8   :  { %v1051_v61 = vpop.permute.xlu1 %1050  ;;  %v1140_v63 = vrot.slane %v1075_v34, %v1083_v59 }
 0x3a9   :  { %v1108_v58 = vrot.slane %v1051_v61, %v1083_v59 }
 0x3aa   :  { %v1164_v22 = vsel %vm1155_vm7, %v1140_v63, %v1163_v45 }
 0x3ab   :  { %v1078_v35 = vpop.permute.xlu0 %1077  ;;  %v1156_v23 = vsel %vm1155_vm7, %v1108_v58, %v1154_v19 }
 0x3ac   :  { %v1144_v17 = vrot.slane %v1078_v35, %v1083_v59  ;;  %v1054_v44 = vpop.permute.xlu1 %1053 }
 0x3ad   :  { %v1112_v60 = vrot.slane %v1054_v44, %v1083_v59 }
 0x3ae   :  { %v1165_v43 = vsel %vm1157_vm8, %v1144_v17, %v1164_v22 }
 0x3af   :  { %v1172_v50 = vsel %vm1168_vm9, %v1165_v43, 0.0  ;;  %v1158_v26 = vsel %vm1157_vm8, %v1112_v60, %v1156_v23 }
 0x3b0   :  { %1173 = vadd.xlane.f32.xlu0 %v1172_v50  ;;  %v1169_v46 = vsel %vm1168_vm9, %v1158_v26, 0.0 }
 0x3b1   :  { %1170 = vadd.xlane.f32.xlu1 %v1169_v46 }
 0x439   :  { %v1174_v28 = vpop.xlane.xlu0 %1173 }
 0x43a   :  { %v1176_v30 = vadd.f32 1e-05, %v1174_v28  ;;  %v1171_v31 = vpop.xlane.xlu1 %1170 }
 0x43b   :  { %v1175_v33 = vadd.f32 1e-05, %v1171_v31 }
 0x43c   :  { %v1214_v32 = vrot.slane %v1176_v30, %v2591_v42  ;;  %v1218_v40 = vrot.slane %v1176_v30, %v2680_v1  ;;  %v1222_v41 = vrot.slane %v1176_v30, %v2691_v5  ;;  %v1226_v53 = vrot.slane %v1176_v30, %v2696_v9 }
 0x43d   :  { %v1186_v38 = vrot.slane %v1175_v33, %v2680_v1  ;;  %v1182_v59 = vrot.slane %v1175_v33, %v2591_v42  ;;  %v1190_v29 = vrot.slane %v1175_v33, %v2691_v5  ;;  %v1194_v34 = vrot.slane %v1175_v33, %v2696_v9 }
 0x43e   :  { %v1198_v51 = vrot.slane %v1175_v33, %v2701_v11  ;;  %v1230_v42 = vrot.slane %v1176_v30, %v2701_v11  ;;  %v1202_v47 = vrot.slane %v1175_v33, %v2706_v14  ;;  %v1234_v62 = vrot.slane %v1176_v30, %v2706_v14 }
 0x43f   :  { %2148 = vrcp.f32 %v1186_v38  ;;  %v1206_v11 = vrot.slane %v1175_v33, %v2711_v18  ;;  %v1238_v4 = vrot.slane %v1176_v30, %v2711_v18  ;;  %v1210_v14 = vrot.slane %v1175_v33, %v2716_v20 }
 0x440   :  { %2150 = vrcp.f32 %v1182_v59  ;;  %v1242_v54 = vrot.slane %v1176_v30, %v2716_v20  ;;  %v2181_v30 = vld [vmem:[#allocation6 + $0x20] sm:$0xff]  }
 0x441   :  { %2152 = vrcp.f32 %v1214_v32 }
 0x442   :  { %2154 = vrcp.f32 %v1218_v40 }
 0x443   :  { %2156 = vrcp.f32 %v1190_v29 }
 0x444   :  { %2158 = vrcp.f32 %v1222_v41 }
 0x445   :  { %2160 = vrcp.f32 %v1194_v34  ;;  %v2182_v34 = vld [vmem:[#allocation6 + $0x8] sm:$0xff]  }
 0x446   :  { %2162 = vrcp.f32 %v1226_v53  ;;  %v1293_v53 = vunpack.c.l.bf16 %v2182_v34 }
 0x447   :  { %2164 = vrcp.f32 %v1198_v51 }
 0x448   :  { %2166 = vrcp.f32 %v1230_v42 }
 0x449   :  { %2168 = vrcp.f32 %v1202_v47 }
 0x44a   :  { %2170 = vrcp.f32 %v1234_v62 }
 0x44b   :  { %2172 = vrcp.f32 %v1206_v11 }
 0x44c   :  { %v2149_v1 = vpop.eup %2148  ;;  %2174 = vrcp.f32 %v1238_v4  ;;  %v1294_v4 = vunpack.c.h.bf16 %v2182_v34  ;;  %v2878_v34 = vld [vmem:[#allocation6 + $0x38] sm:$0xff]  }
 0x44d   :  { %v2151_v36 = vpop.eup %2150  ;;  %v1262_v61 = vmul.f32 %v2149_v1, %v2769_v21  ;;  %2176 = vrcp.f32 %v1210_v14  ;;  %v2183_v1 = vld [vmem:[#allocation6 + $0x28] sm:$0xff]  }
 0x44e   :  { %v2153_v5 = vpop.eup %2152  ;;  %v1260_v55 = vmul.f32 %v2151_v36, %v2765_v16  ;;  %2178 = vrcp.f32 %v1242_v54  ;;  %v1301_v36 = vunpack.c.l.bf16 %v2183_v1  ;;  %v1302_v14 = vunpack.c.h.bf16 %v2183_v1 }
 0x44f   :  { %v2155_v9 = vpop.eup %2154  ;;  %1314 = vperm.xlu1 %2078, %v1262_v61   ;;  %v1276_v63 = vmul.f32 %v2153_v5, %v2779_v27 }
 0x450   :  { %1309 = vperm.xlu0 %2077, %v1260_v55   ;;  %v2157_v57 = vpop.eup %2156  ;;  %v1278_v21 = vmul.f32 %v2155_v9, %v2775_v24 }
 0x451   :  { %v2159_v58 = vpop.eup %2158  ;;  %v1264_v16 = vmul.f32 %v2157_v57, %v2785_v37 }
 0x452   :  { %v2161_v7 = vpop.eup %2160  ;;  %v1280_v27 = vmul.f32 %v2159_v58, %v2783_v13 }
 0x453   :  { %1349 = vperm.xlu1 %2078, %v1276_v63   ;;  %v2163_v35 = vpop.eup %2162  ;;  %v1266_v24 = vmul.f32 %v2161_v7, %v2791_v39 }
 0x454   :  { %1354 = vperm.xlu0 %2077, %v1278_v21   ;;  %v2165_v18 = vpop.eup %2164  ;;  %v1282_v12 = vmul.f32 %v2163_v35, %v2789_v25 }
 0x455   :  { %v2167_v37 = vpop.eup %2166  ;;  %v1268_v45 = vmul.f32 %v2165_v18, %v2797_v49 }
 0x456   :  { %v2169_v17 = vpop.eup %2168  ;;  %v1284_v13 = vmul.f32 %v2167_v37, %v2795_v56 }
 0x457   :  { %1319 = vperm.xlu1 %2078, %v1264_v16   ;;  %v2171_v44 = vpop.eup %2170  ;;  %v1270_v20 = vmul.f32 %v2169_v17, %v2803_v3  ;;  %v2096_v3 = vld [vmem:[#allocation12 + $0x8] sm:$0xff]  }
 0x458   :  { %1359 = vperm.xlu0 %2077, %v1280_v27   ;;  %v2173_v19 = vpop.eup %2172  ;;  %v1286_v39 = vmul.f32 %v2171_v44, %v2801_v48  ;;  %2031 = vmatpush3.bf16.msra.mxu0 %v2096_v3  ;;  %v2097_v48 = vld [vmem:[#allocation12] sm:$0xff]  }
 0x459   :  { %v2175_v60 = vpop.eup %2174  ;;  %v1272_v25 = vmul.f32 %v2173_v19, %v2809_v6  ;;  %2032 = vmatprep.subr.bf16.mxu0 %v2389_v0  ;;  %v2180_v6 = vld [vmem:[#allocation6] sm:$0xff]  }
 0x45a   :  { %v2177_v22 = vpop.eup %2176  ;;  %v1288_v43 = vmul.f32 %v2175_v60, %v2807_v52  ;;  %v1292_v50 = vunpack.c.h.bf16 %v2180_v6  ;;  %v1291_v52 = vunpack.c.l.bf16 %v2180_v6 }
 0x45b   :  { %1324 = vperm.xlu1 %2078, %v1266_v24   ;;  %v2179_v49 = vpop.eup %2178  ;;  %v1274_v56 = vmul.f32 %v2177_v22, %v2815_v10  ;;  %v1299_v10 = vunpack.c.l.bf16 %v2181_v30 }
 0x45c   :  { %1364 = vperm.xlu0 %2077, %v1282_v12   ;;  %v1290_v23 = vmul.f32 %v2179_v49, %v2813_v8  ;;  %2033 = vmatpush3.bf16.msra.mxu0 %v2097_v48  ;;  %v1300_v8 = vunpack.c.h.bf16 %v2181_v30 }
 0x45d   :  { %2038 = vmatprep.subr.bf16.mxu0 %v2389_v0 }
 0x45f   :  { %1329 = vperm.xlu1 %2078, %v1268_v45  }
 0x460   :  { %1369 = vperm.xlu0 %2077, %v1284_v13  }
 0x463   :  { %1334 = vperm.xlu1 %2078, %v1270_v20  }
 0x464   :  { %1374 = vperm.xlu0 %2077, %v1286_v39  }
 0x467   :  { %1339 = vperm.xlu1 %2078, %v1272_v25   ;;  %v2184_v25 = vld [vmem:[#allocation6 + $0x10] sm:$0xff]  }
 0x468   :  { %1379 = vperm.xlu0 %2077, %v1288_v43   ;;  %v1295_v22 = vunpack.c.l.bf16 %v2184_v25 }
 0x46b   :  { %1344 = vperm.xlu1 %2078, %v1274_v56  }
 0x46c   :  { %1384 = vperm.xlu0 %2077, %v1290_v23  }
 0x4ca   :  { %v1315_v26 = vpop.permute.xlu1 %1314 }
 0x4cb   :  { %v1388_v46 = vmul.f32 %v1315_v26, %v1292_v50  ;;  %v1310_v28 = vpop.permute.xlu0 %1309 }
 0x4cc   :  { %v1387_v31 = vmul.f32 %v1310_v28, %v1291_v52  ;;  %v2185_v28 = vld [vmem:[#allocation6 + $0x30] sm:$0xff]  }
 0x4cd   :  { %v1410_v33 = vsel %vm211_vm1, %v1388_v46, 0.0  ;;  %v1303_v30 = vunpack.c.l.bf16 %v2185_v28 }
 0x4ce   :  { %v1411_v38 = vrot.slane %v1410_v33, 4  ;;  %v1403_v59 = vsel %vm211_vm1, %v1387_v31, 0.0  ;;  %v1350_v32 = vpop.permute.xlu1 %1349 }
 0x4cf   :  { %v1404_v40 = vrot.slane %v1403_v59, 4  ;;  %v1395_v29 = vmul.f32 %v1350_v32, %v1299_v10  ;;  %v1355_v41 = vpop.permute.xlu0 %1354  ;;  %v1296_v10 = vunpack.c.h.bf16 %v2184_v25 }
 0x4d0   :  { %v1412_v51 = vadd.f32 %v1411_v38, %v1410_v33  ;;  %v1396_v42 = vmul.f32 %v1355_v41, %v1300_v8 }
 0x4d1   :  { %v1405_v61 = vadd.f32 %v1404_v40, %v1403_v59  ;;  %v1459_v47 = vsel %vm211_vm1, %v1395_v29, 0.0  ;;  %v1304_v59 = vunpack.c.h.bf16 %v2185_v28  ;;  %v2186_v29 = vld [vmem:[#allocation6 + $0x18] sm:$0xff]  }
 0x4d2   :  { %v1413_v5 = vrot.slane %v1412_v51, 2  ;;  %v1460_v55 = vrot.slane %v1459_v47, 4  ;;  %v1466_v62 = vsel %vm211_vm1, %v1396_v42, 0.0  ;;  %v1320_v9 = vpop.permute.xlu1 %1319  ;;  %v1297_v41 = vunpack.c.l.bf16 %v2186_v29 }
 0x4d3   :  { %v1406_v63 = vrot.slane %v1405_v61, 2  ;;  %v1467_v11 = vrot.slane %v1466_v62, 4  ;;  %v1389_v57 = vmul.f32 %v1320_v9, %v1293_v53  ;;  %v1360_v21 = vpop.permute.xlu0 %1359  ;;  %v1305_v53 = vunpack.c.l.bf16 %v2878_v34 }
 0x4d4   :  { %v1461_v58 = vadd.f32 %v1460_v55, %v1459_v47  ;;  %v1397_v16 = vmul.f32 %v1360_v21, %v1301_v36  ;;  %v1414_v7 = vadd.f32 %v1413_v5, %v1412_v51 }
 0x4d5   :  { %v1468_v27 = vadd.f32 %v1467_v11, %v1466_v62  ;;  %v1417_v54 = vsel %vm211_vm1, %v1389_v57, 0.0  ;;  %v1407_v35 = vadd.f32 %v1406_v63, %v1405_v61  ;;  %v1298_v62 = vunpack.c.h.bf16 %v2186_v29 }
 0x4d6   :  { %v1473_v24 = vsel %vm211_vm1, %v1397_v16, 0.0  ;;  %v1325_v18 = vpop.permute.xlu1 %1324  ;;  %v1462_v12 = vrot.slane %v1461_v58, 2  ;;  %v1418_v37 = vrot.slane %v1417_v54, 4  ;;  %v1415_v20 = vrot.slane %v1414_v7, 1 }
 0x4d7   :  { %v1390_v45 = vmul.f32 %v1325_v18, %v1294_v4  ;;  %v1365_v17 = vpop.permute.xlu0 %1364  ;;  %v1469_v13 = vrot.slane %v1468_v27, 2  ;;  %v1474_v19 = vrot.slane %v1473_v24, 4  ;;  %v1408_v39 = vrot.slane %v1407_v35, 1 }
 0x4d8   :  { %v1398_v44 = vmul.f32 %v1365_v17, %v1302_v14  ;;  %v1463_v49 = vadd.f32 %v1462_v12, %v1461_v58  ;;  %v1419_v56 = vadd.f32 %v1418_v37, %v1417_v54  ;;  %v1416_v6 = vadd.f32 %v1415_v20, %v1414_v7 }
 0x4d9   :  { %v1424_v60 = vsel %vm211_vm1, %v1390_v45, 0.0  ;;  %v1470_v3 = vadd.f32 %v1469_v13, %v1468_v27  ;;  %v1475_v50 = vadd.f32 %v1474_v19, %v1473_v24  ;;  %v1409_v26 = vadd.f32 %v1408_v39, %v1407_v35 }
 0x4da   :  { %v1330_v43 = vpop.permute.xlu1 %1329  ;;  %v1480_v48 = vsel %vm211_vm1, %v1398_v44, 0.0  ;;  %v1425_v52 = vrot.slane %v1424_v60, 4  ;;  %v1464_v8 = vrot.slane %v1463_v49, 1  ;;  %v1420_v33 = vrot.slane %v1419_v56, 2 }
 0x4db   :  { %v1370_v23 = vpop.permute.xlu0 %1369  ;;  %v1391_v46 = vmul.f32 %v1330_v43, %v1295_v22  ;;  %v1481_v38 = vrot.slane %v1480_v48, 4  ;;  %v1471_v32 = vrot.slane %v1470_v3, 1  ;;  %v1582_v51 = vpack.c.bf16 %v1416_v6, %v1416_v6 }
 0x4dc   :  { %v1476_v42 = vrot.slane %v1475_v50, 2  ;;  %v1426_v1 = vadd.f32 %v1425_v52, %v1424_v60  ;;  %v1581_v47 = vpack.c.bf16 %v1409_v26, %v1409_v26  ;;  %v1399_v5 = vmul.f32 %v1370_v23, %v1303_v30 }
 0x4dd   :  { %v1431_v40 = vsel %vm211_vm1, %v1391_v46, 0.0  ;;  %v1465_v9 = vadd.f32 %v1464_v8, %v1463_v49  ;;  %v1421_v63 = vadd.f32 %v1420_v33, %v1419_v56  ;;  %v1482_v11 = vadd.f32 %v1481_v38, %v1480_v48 }
 0x4de   :  { %v1335_v31 = vpop.permute.xlu1 %1334  ;;  %v1432_v36 = vrot.slane %v1431_v40, 4  ;;  %v1472_v4 = vadd.f32 %v1471_v32, %v1470_v3  ;;  %v1487_v58 = vsel %vm211_vm1, %v1399_v5, 0.0  ;;  %v1306_v14 = vunpack.c.h.bf16 %v2878_v34 }
 0x4df   :  { %v1375_v61 = vpop.permute.xlu0 %1374  ;;  %v1392_v55 = vmul.f32 %v1335_v31, %v1296_v10  ;;  %v2884_v7 = vunpack.c.l.b16 %v1582_v51  ;;  %v1477_v27 = vadd.f32 %v1476_v42, %v1475_v50  ;;  %v1427_v54 = vrot.slane %v1426_v1, 2 }
 0x4e0   :  { %v1433_v57 = vadd.f32 %v1432_v36, %v1431_v40  ;;  %v1488_v35 = vrot.slane %v1487_v58, 4  ;;  %v2886_v24 = vunpack.c.l.b16 %v1581_v47  ;;  %v1400_v37 = vmul.f32 %v1375_v61, %v1304_v59 }
 0x4e1   :  { %v1438_v16 = vsel %vm211_vm1, %v1392_v55, 0.0  ;;  %v1589_v45 = vpack.c.bf16 %v1465_v9, %v1465_v9  ;;  %v1422_v17 = vrot.slane %v1421_v63, 1  ;;  %v1483_v13 = vrot.slane %v1482_v11, 2 }
 0x4e2   :  { %v1340_v21 = vpop.permute.xlu1 %1339  ;;  %v1434_v18 = vrot.slane %v1433_v57, 2  ;;  %v1439_v12 = vrot.slane %v1438_v16, 4  ;;  %v1489_v44 = vadd.f32 %v1488_v35, %v1487_v58  ;;  %v1590_v19 = vpack.c.bf16 %v1472_v4, %v1472_v4 }
 0x4e3   :  { %v1380_v20 = vpop.permute.xlu0 %1379  ;;  %v1494_v60 = vsel %vm211_vm1, %v1400_v37, 0.0  ;;  %v1393_v25 = vmul.f32 %v1340_v21, %v1297_v41  ;;  %v1478_v22 = vrot.slane %v1477_v27, 1  ;;  %v1428_v43 = vadd.f32 %v1427_v54, %v1426_v1 }
 0x4e4   :  { %v1440_v39 = vadd.f32 %v1439_v12, %v1438_v16  ;;  %v1490_v49 = vrot.slane %v1489_v44, 2  ;;  %v1495_v56 = vrot.slane %v1494_v60, 4  ;;  %v1435_v3 = vadd.f32 %v1434_v18, %v1433_v57 }
 0x4e5   :  { %v1445_v6 = vsel %vm211_vm1, %v1393_v25, 0.0  ;;  %v1401_v50 = vmul.f32 %v1380_v20, %v1305_v53  ;;  %v2890_v52 = vunpack.c.l.b16 %v1589_v45  ;;  %v1484_v26 = vadd.f32 %v1483_v13, %v1482_v11 }
 0x4e6   :  { %v1345_v23 = vpop.permute.xlu1 %1344  ;;  %v1441_v48 = vrot.slane %v1440_v39, 2  ;;  %v1491_v46 = vadd.f32 %v1490_v49, %v1489_v44  ;;  %v1496_v28 = vadd.f32 %v1495_v56, %v1494_v60  ;;  %v1446_v10 = vrot.slane %v1445_v6, 4 }
 0x4e7   :  { %v1501_v31 = vsel %vm211_vm1, %v1401_v50, 0.0  ;;  %v1394_v8 = vmul.f32 %v1345_v23, %v1298_v62  ;;  %v1633_v33 = vunpack.c.l.b16 %v1590_v19  ;;  %v1423_v38 = vadd.f32 %v1422_v17, %v1421_v63  ;;  %v1385_v40 = vpop.permute.xlu0 %1384 }
 0x4e8   :  { %v1442_v30 = vadd.f32 %v1441_v48, %v1440_v39  ;;  %v1429_v59 = vrot.slane %v1428_v43, 1  ;;  %v1497_v32 = vrot.slane %v1496_v28, 2  ;;  %v1436_v29 = vrot.slane %v1435_v3, 1 }
 0x4e9   :  { %v1447_v41 = vadd.f32 %v1446_v10, %v1445_v6  ;;  %v1502_v34 = vrot.slane %v1501_v31, 4  ;;  %v1452_v53 = vsel %vm211_vm1, %v1394_v8, 0.0  ;;  %v1485_v51 = vrot.slane %v1484_v26, 1 }
 0x4ea   :  { %v1443_v42 = vrot.slane %v1442_v30, 1  ;;  %v1498_v1 = vadd.f32 %v1497_v32, %v1496_v28  ;;  %v1453_v36 = vrot.slane %v1452_v53, 4  ;;  %v1492_v61 = vrot.slane %v1491_v46, 1 }
 0x4eb   :  { %v1448_v47 = vrot.slane %v1447_v41, 2  ;;  %v1503_v5 = vadd.f32 %v1502_v34, %v1501_v31  ;;  %v1402_v55 = vmul.f32 %v1385_v40, %v1306_v14  ;;  %v1479_v9 = vadd.f32 %v1478_v22, %v1477_v27 }
 0x4ec   :  { %v1430_v62 = vadd.f32 %v1429_v59, %v1428_v43  ;;  %v1499_v11 = vrot.slane %v1498_v1, 1  ;;  %v1454_v63 = vadd.f32 %v1453_v36, %v1452_v53  ;;  %v1437_v57 = vadd.f32 %v1436_v29, %v1435_v3 }
 0x4ed   :  { %v1449_v21 = vadd.f32 %v1448_v47, %v1447_v41  ;;  %v1504_v4 = vrot.slane %v1503_v5, 2  ;;  %v1508_v58 = vsel %vm211_vm1, %v1402_v55, 0.0  ;;  %v1486_v16 = vadd.f32 %v1485_v51, %v1484_v26 }
 0x4ee   :  { %v1444_v54 = vadd.f32 %v1443_v42, %v1442_v30  ;;  %v1455_v35 = vrot.slane %v1454_v63, 2  ;;  %v1509_v18 = vrot.slane %v1508_v58, 4  ;;  %v1583_v12 = vpack.c.bf16 %v1423_v38, %v1423_v38 }
 0x4ef   :  { %v1493_v37 = vadd.f32 %v1492_v61, %v1491_v46  ;;  %v1450_v45 = vrot.slane %v1449_v21, 1  ;;  %v1505_v17 = vadd.f32 %v1504_v4, %v1503_v5  ;;  %v1584_v13 = vpack.c.bf16 %v1430_v62, %v1430_v62  ;;  %v2099_v4 = vld [vmem:[#allocation14] sm:$0xff]  }
 0x4f0   :  { %v1500_v44 = vadd.f32 %v1499_v11, %v1498_v1  ;;  %v1456_v14 = vadd.f32 %v1455_v35, %v1454_v63  ;;  %v1510_v27 = vadd.f32 %v1509_v18, %v1508_v58  ;;  %v1591_v20 = vpack.c.bf16 %v1479_v9, %v1479_v9  ;;  %v2100_v58 = vld [vmem:[%s2971_s17 + $0x18] sm:$0xff]   ;;  %v1938_v35 = vld [vmem:[%s2966_s12] ss:$0 sm:$0xff] }
 0x4f1   :  { %v1585_v19 = vpack.c.bf16 %v1437_v57, %v1437_v57  ;;  %v1451_v39 = vadd.f32 %v1450_v45, %v1449_v21  ;;  %v1506_v60 = vrot.slane %v1505_v17, 1  ;;  %v1592_v25 = vpack.c.bf16 %v1486_v16, %v1486_v16  ;;  %v2098_v21 = vld [vmem:[#allocation14 + $0x8] sm:$0xff]   ;;  %2047 = vmatpush3.bf16.msra.mxu1 %v2100_v58  ;;  %v1942_v18 = vld [vmem:[%s2968_s14] ss:$0 sm:$0xff] }
 0x4f2   :  { %v1586_v22 = vpack.c.bf16 %v1444_v54, %v1444_v54  ;;  %v1457_v43 = vrot.slane %v1456_v14, 1  ;;  %v1511_v49 = vrot.slane %v1510_v27, 2  ;;  %v1626_v56 = vunpack.c.l.b16 %v1583_v12  ;;  %v2101_v16 = vld [vmem:[%s2971_s17 + $0x10] sm:$0xff]   ;;  %2048 = vmatprep.subr.bf16.mxu1 %v2389_v0  ;;  %v2102_v54 = vld [vmem:[%s2971_s17 + $0x8] sm:$0xff]  }
 0x4f3   :  { %v1593_v23 = vpack.c.bf16 %v1493_v37, %v1493_v37  ;;  %v1587_v3 = vpack.c.bf16 %v1451_v39, %v1451_v39  ;;  %v1507_v48 = vadd.f32 %v1506_v60, %v1505_v17  ;;  %v1627_v6 = vunpack.c.l.b16 %v1584_v13 }
 0x4f4   :  { %v1594_v50 = vpack.c.bf16 %v1500_v44, %v1500_v44  ;;  %v1458_v26 = vadd.f32 %v1457_v43, %v1456_v14  ;;  %v1512_v46 = vadd.f32 %v1511_v49, %v1510_v27  ;;  %v1640_v28 = vsel %vm1145_vm2, %v2884_v7, %v2886_v24 }
 0x4f5   :  { %v1634_v30 = vunpack.c.l.b16 %v1591_v20  ;;  %v1628_v10 = vunpack.c.l.b16 %v1585_v19  ;;  %v1595_v31 = vpack.c.bf16 %v1507_v48, %v1507_v48  ;;  %v1635_v8 = vunpack.c.l.b16 %v1592_v25  ;;  %2049 = vmatpush3.bf16.msra.mxu1 %v2101_v16 }
 0x4f6   :  { %v1629_v38 = vunpack.c.l.b16 %v1586_v22  ;;  %v1588_v59 = vpack.c.bf16 %v1458_v26, %v1458_v26  ;;  %v1513_v32 = vrot.slane %v1512_v46, 1  ;;  %v1647_v40 = vsel %vm1145_vm2, %v1633_v33, %v2890_v52  ;;  %2050 = vmatprep.subr.bf16.mxu1 %v2389_v0 }
 0x4f7   :  { %v1641_v29 = vsel %vm1147_vm3, %v1626_v56, %v1640_v28  ;;  %v1636_v41 = vunpack.c.l.b16 %v1593_v23  ;;  %v1630_v34 = vunpack.c.l.b16 %v1587_v3  ;;  %v1637_v51 = vunpack.c.l.b16 %v1594_v50 }
 0x4f8   :  { %v1642_v53 = vsel %vm1149_vm4, %v1627_v6, %v1641_v29  ;;  %v1631_v42 = vunpack.c.l.b16 %v1588_v59  ;;  %v1514_v1 = vadd.f32 %v1513_v32, %v1512_v46  ;;  %v1648_v7 = vsel %vm1147_vm3, %v1634_v30, %v1647_v40 }
 0x4f9   :  { %v1643_v24 = vsel %vm1151_vm5, %v1628_v10, %v1642_v53  ;;  %v1638_v36 = vunpack.c.l.b16 %v1595_v31  ;;  %v1649_v61 = vsel %vm1149_vm4, %v1635_v8, %v1648_v7  ;;  %2051 = vmatpush3.bf16.msra.mxu1 %v2102_v54  ;;  %v1573_v12 = vadd.f32 %v1938_v35, %v2613_v2  ;;  %v2103_v2 = vld [vmem:[%s2971_s17] sm:$0xff]   ;;  %s2328_s17 = scalar_lea.vmem %s1892_s1, 256 }
 0x4fa   :  { %v1644_v47 = vsel %vm1153_vm6, %v1629_v38, %v1643_v24  ;;  %v1596_v5 = vpack.c.bf16 %v1514_v1, %v1514_v1  ;;  %v1650_v52 = vsel %vm1151_vm5, %v1636_v41, %v1649_v61  ;;  %2052 = vmatprep.subr.bf16.mxu1 %v2389_v0  ;;  %v1576_v44 = vadd.f32 %v1938_v35, %v2620_v15  ;;  %v1946_v15 = vld [vmem:[%s2970_s16] ss:$0 sm:$0xff]  ;;  %p2329_p7 = scmp.ne.s32.totalorder %s1892_s1, %s2328_s17  ;;  %p2334_p9 = scmp.lt.s32.totalorder %s2328_s17, %s2328_s17 }
 0x4fb   :  { %v1645_v33 = vsel %vm1155_vm7, %v1630_v34, %v1644_v47  ;;  %v1651_v55 = vsel %vm1153_vm6, %v1637_v51, %v1650_v52  ;;  %v1579_v13 = vmax.f32 %v1573_v12, 0.0 }
 0x4fc   :  { %v1639_v9 = vunpack.c.l.b16 %v1596_v5  ;;  %v1646_v62 = vsel %vm1157_vm8, %v1631_v42, %v1645_v33  ;;  %v1652_v11 = vsel %vm1155_vm7, %v1638_v36, %v1651_v55  ;;  %v1580_v39 = vmax.f32 %v1576_v44, 0.0  ;;  %p2335_p10 = por %p2334_p9, %p2333_p8 }
 0x4fd   :  { %2053 = vmatpush3.bf16.msra.mxu1 %v2103_v2 }
 0x4fe   :  { %v1653_v63 = vsel %vm1157_vm8, %v1639_v9, %v1652_v11  ;;  %p2336_p11 = pnand %p2335_p10, %p2329_p7 }
 0x4ff   :  { %v1654_v57 = vpack.c.b16 %v1653_v63, %v1646_v62 }
 0x501   :  { %2035 = vmatmul.mubr.msk.bf16.vlgmr.msra.gmra.mxu0 %vm211_vm1, %v1654_v57 }
 0x502   :  { %2042 = vmatprep.mubr.msk.bf16.mxu0 %vm2390_vm0, %v2389_v0  ;;  %2039 = vmatpush3.bf16.msra.mxu0 %v2098_v21 }
 0x503   :  { %2040 = vmatprep.subr.bf16.mxu0 %v2389_v0 }
 0x506   :  { %2041 = vmatpush3.bf16.msra.mxu0 %v2099_v4 }
 0x5c1   :  { %v1704_v37 = vpop.f32.mrf.mxu0 }
 0x5c2   :  { %v1705_v45 = vadd.f32 %v1942_v18, %v1704_v37 }
 0x5c3   :  { %v2036_v17 = vpop.f32.mrf.mxu0 }
 0x5c4   :  { %v1711_v14 = vmax.f32 %v1705_v45, 0.0 }
 0x5c5   :  { %v1707_v27 = vpop.f32.mrf.mxu0 }
 0x5c6   :  { %v1713_v20 = vmul.f32 %v1711_v14, %v1579_v13  ;;  %v1708_v0 = vadd.f32 %v1942_v18, %v1707_v27 }
 0x5c7   :  { %v2037_v19 = vpop.f32.mrf.mxu0 }
 0x5c8   :  { %1715 = vst.msk [vmem:[#allocation16] sm:$0xff] %vm211_vm1, %v1713_v20  ;;  %v1712_v60 = vmax.f32 %v1708_v0, 0.0 }
 0x5ca   :  { %v1714_v25 = vmul.f32 %v1712_v60, %v1580_v39 }
 0x5cc   :  { %1716 = vst.msk [vmem:[#allocation16 + $0x8] sm:$0xff] %vm211_vm1, %v1714_v25  ;;  %v1717_v22 = vpack.c.bf16 %v1714_v25, %v1713_v20 }
 0x5ce   :  { %2043 = vmatmul.mubr.msk.bf16.vlgmr.msra.gmra.mxu0 %vm211_vm1, %v1717_v22 }
 0x68e   :  { %v1778_v43 = vpop.f32.mrf.mxu0 }
 0x68f   :  { %v1779_v56 = vadd.f32 %v1946_v15, %v1778_v43 }
 0x690   :  { %v2044_v49 = vpop.f32.mrf.mxu0 }
 0x691   :  { %v1785_v6 = vmax.f32 %v1779_v56, 0.0 }
 0x692   :  { %v1781_v23 = vpop.f32.mrf.mxu0 }
 0x693   :  { %v1782_v3 = vadd.f32 %v1946_v15, %v1781_v23 }
 0x694   :  { %v2045_v48 = vpop.f32.mrf.mxu0 }
 0x695   :  { %v1786_v50 = vmax.f32 %v1782_v3, 0.0 }
 0x697   :  { %v1787_v26 = vpack.c.bf16 %v1786_v50, %v1785_v6 }
 0x699   :  { %2055 = vmatmul.mubr.msk.bf16.vlgmr.msra.gmra.mxu1 %vm1827_vm10, %v1787_v26 }
 0x69a   :  { %2339 = shalt.err (!%p2336_p11)
}
 0x69b   :  { %s2394_s16 = smov 128   ;;  %s2395_s9 = smov 8   ;;  %v1950_v46 = vld [vmem:[%s2972_s18] ss:$0 sm:$0xff] }
 0x69c   :  { %1897 = dma.vmem_to_hbm [thread:$0]  %s1892_s1, 256, %s2974_s20, [#allocation17], %s2394_s16, %s2394_s16, %s2395_s9  }
 0x69d   :  { %s2396_s2 = smov [#allocation15]  }
 0x69e   :  { %s1879_s26 = sshll.u32 %s2396_s2, 4  ;;  %s1880_s26 = int_to_ptr.vmem [resolvable:$true] %s1879_s26 }
 0x69f   :  { %s2348_s7 = scalar_lea.vmem %s1880_s26, 256  ;;  %p2353_p13 = scmp.lt.s32.totalorder %s1880_s26, %s1880_s26 }
 0x6a0   :  { %p2349_p12 = scmp.ne.s32.totalorder %s1880_s26, %s2348_s7  ;;  %p2354_p0 = scmp.lt.s32.totalorder %s2348_s7, %s2348_s7 }
 0x6a2   :  { %p2355_p1 = por %p2354_p0, %p2353_p13 }
 0x6a4   :  { %p2356_p2 = pnand %p2355_p1, %p2349_p12 }
 0x759   :  { %v1865_v28 = vpop.f32.mrf.mxu1 }
 0x75a   :  { %v1866_v30 = vadd.f32 %v1950_v46, %v1865_v28 }
 0x75b   :  { %v2056_v10 = vpop.f32.mrf.mxu1 }
 0x75c   :  { %1872 = vst [vmem:[#allocation15] sm:$0xff] %v1866_v30 }
 0x75d   :  { %v1868_v31 = vpop.f32.mrf.mxu1 }
 0x75e   :  { %v1869_v8 = vadd.f32 %v1950_v46, %v1868_v31 }
 0x75f   :  { %v2057_v38 = vpop.f32.mrf.mxu1 }
 0x760   :  { %1873 = vst [vmem:[#allocation15 + $0x8] sm:$0xff] %v1869_v8 }
 0x761   :  { %2359 = shalt.err (!%p2356_p2)
}
 0x762   :  { %1885 = dma.vmem_to_hbm [thread:$0]  %s1880_s26, 256, %s2973_s19, [#allocation5], %s2394_s16, %s2394_s16, %s2395_s9  }
 0x763   :  { %2376 = dma.done.wait [#allocation5], 256  }
 0x764   :  { %2377 = vsyncadd [#allocation5], 4294967040 }
 0x765   :  { %2378 = dma.done.wait [#allocation17], 256  }
 0x766   :  { %2379 = vsyncadd [#allocation17], 4294967040 }
 0x767   :  { %1904 = vsyncpa [#allocation4], 1 }
 0x768   :  { %1905 = vsyncpa [#allocation7], 1 }
 0x769   :  { %1906 = vsyncpa [#allocation10], 1 }
 0x76a   :  { %1907 = vsyncpa [#allocation13], 1 }
 0x76b   :  { %1908 = vsyncpa [#allocation5], 1 }
 0x76c   :  { %1909 = vsyncpa [#allocation17], 1 }

</bundles_post_ra>
